<compile_context>
chip_gen: v6e
topology: v6e:2x2x1
jax: 0.10.0
libtpu: 0.0.40
codegen_flags: <defaults>
</compile_context>

<pallas_src>
import math
from functools import partial

import jax
import jax.numpy as jnp
import numpy as np
from jax import lax
from jax.experimental import pallas as pl
from jax.experimental.pallas import tpu as pltpu

VMEM_LIMIT = 64 * 1024 * 1024  # safe on v5e/v6e (128 MiB phys) and v7x (64 MiB)


# ----------------------------------------------------------------------------
# shared math helpers (valid inside Pallas kernels and in the JAX reference)
# ----------------------------------------------------------------------------
def _layernorm(v, g, b, eps=1e-5):
    mu = jnp.mean(v, axis=-1, keepdims=True)
    var = jnp.mean((v - mu) ** 2, axis=-1, keepdims=True)
    return (v - mu) * lax.rsqrt(var + eps) * g + b


def _batch_tile(N, max_tile=8):
    """Largest divisor of N that is <= max_tile (batch elements per grid step)."""
    for bt in range(min(N, max_tile), 0, -1):
        if N % bt == 0:
            return bt
    return 1


# ----------------------------------------------------------------------------
# Pallas kernel: one ResidualAttentionBlock over a tile of Bt batch elements
#   x + out_proj(MHA(ln_1(x)));  then  x + c_proj(QuickGELU(c_fc(ln_2(x))))
# grid = (N // Bt,): batch-tile axis, marked "parallel".
# Matmul weights arrive pre-transposed to (in, out) and cast to bf16.
# ----------------------------------------------------------------------------
def _block_kernel(x_ref,
                  ln1g, ln1b, wqkv, bqkv, wout, bout,
                  ln2g, ln2b, wfc, bfc, wproj, bproj,
                  o_ref, *, D, H, L, Bt):
    hd = D // H
    scale = 1.0 / math.sqrt(hd)
    # flatten the batch tile into the matmul row dim (leading-dim collapse only)
    x = x_ref[...].reshape(Bt * L, D)                           # (Bt*L, D) fp32

    # ---- attention branch: x + out_proj(MHA(ln_1(x))) ----
    h = _layernorm(x, ln1g[0], ln1b[0]).astype(jnp.bfloat16)
    qkv = jnp.dot(h, wqkv[...], preferred_element_type=jnp.float32) + bqkv[0]
    qkv = qkv.astype(jnp.bfloat16)                              # (Bt*L, 3D)

    # head split via static lane slices -> (H*Bt, L, hd) batched tensors
    def _heads(base):
        per_head = [qkv[:, base + hh * hd: base + (hh + 1) * hd].reshape(Bt, L, hd)
                    for hh in range(H)]
        return jnp.stack(per_head).reshape(H * Bt, L, hd)       # g = hh*Bt + b

    q = _heads(0)
    k = _heads(D)
    v = _heads(2 * D)

    # causal mask built in-register (no HBM traffic); finite large-negative
    rows = lax.broadcasted_iota(jnp.int32, (L, L), 0)
    cols = lax.broadcasted_iota(jnp.int32, (L, L), 1)
    mask = jnp.where(cols > rows, jnp.float32(-1e9), jnp.float32(0.0))

    # batched Q.K^T (fp32 accumulation) + softmax in fp32
    s = jnp.einsum("gqd,gkd->gqk", q, k,
                   preferred_element_type=jnp.float32) * scale  # (H*Bt, L, L)
    s = s + mask[None]
    s = s - jnp.max(s, axis=-1, keepdims=True)
    p = jnp.exp(s)
    p = p * pl.reciprocal(jnp.sum(p, axis=-1, keepdims=True), approx=True)

    # batched P.V, merge heads, ONE full-width out-projection matmul
    ctx = jnp.einsum("gqk,gkd->gqd", p.astype(jnp.bfloat16), v,
                     preferred_element_type=jnp.float32)        # (H*Bt, L, hd)
    ctx = ctx.reshape(H, Bt * L, hd)                            # leading-dim split
    ctx = jnp.concatenate([ctx[hh] for hh in range(H)], axis=-1)  # (Bt*L, D)
    attn = jnp.dot(ctx.astype(jnp.bfloat16), wout[...],
                   preferred_element_type=jnp.float32) + bout[0]
    x = x + attn

    # ---- MLP branch: x + c_proj(QuickGELU(c_fc(ln_2(x)))) ----
    h2 = _layernorm(x, ln2g[0], ln2b[0]).astype(jnp.bfloat16)
    f = jnp.dot(h2, wfc[...], preferred_element_type=jnp.float32) + bfc[0]
    f = f * jax.nn.sigmoid(1.702 * f)                           # QuickGELU
    m = jnp.dot(f.astype(jnp.bfloat16), wproj[...],
                preferred_element_type=jnp.float32) + bproj[0]
    o_ref[...] = (x + m).reshape(Bt, L, D)


def residual_block(x, blk_params, *, H, Bt):
    N, L, D = x.shape
    assert N % Bt == 0

    def rep(shape):  # replicated (constant-index) operand: DMA'd once per call
        return pl.BlockSpec(shape, lambda i, _n=len(shape): (0,) * _n)

    # TODO(synk): for very long schedules one could fuse all layers into one
    # pallas_call with a resident VMEM activation (layers as an "arbitrary"
    # inner grid axis), trading layer-stacked weight re-DMA for activation
    # traffic; kept per-layer calls here so weights are fetched exactly once.
    in_specs = [
        pl.BlockSpec((Bt, L, D), lambda i: (i, 0, 0)),  # x (per-batch-tile)
        rep((1, D)), rep((1, D)),                       # ln1 gamma/beta (f32)
        rep((D, 3 * D)), rep((1, 3 * D)),               # W_qkv^T (bf16), b_qkv
        rep((D, D)), rep((1, D)),                       # W_out^T (bf16), b_out
        rep((1, D)), rep((1, D)),                       # ln2 gamma/beta (f32)
        rep((D, 4 * D)), rep((1, 4 * D)),               # W_fc^T (bf16), b_fc
        rep((4 * D, D)), rep((1, D)),                   # W_proj^T (bf16), b_proj
    ]
    return pl.pallas_call(
        partial(_block_kernel, D=D, H=H, L=L, Bt=Bt),
        out_shape=jax.ShapeDtypeStruct((N, L, D), jnp.float32),
        grid=(N // Bt,),
        in_specs=in_specs,
        out_specs=pl.BlockSpec((Bt, L, D), lambda i: (i, 0, 0)),
        compiler_params=pltpu.CompilerParams(
            dimension_semantics=("parallel",),
            vmem_limit_bytes=VMEM_LIMIT),
    )(x, *blk_params)


# ----------------------------------------------------------------------------
# Pallas kernel: final text_norm on the gathered EOT rows + text_projection.
# (LayerNorm is per-row, so LN(x)[eot] == LN(x[eot]) -- same output `o`.)
# Only the (N, D) EOT rows enter the kernel (gathered by XLA glue), so no
# (N, L, D) slab is DMA'd just to read one row per batch element.
# ----------------------------------------------------------------------------
def _pool_project_kernel(x_ref, g_ref, b_ref, proj_ref, o_ref):
    r = _layernorm(x_ref[...], g_ref[0], b_ref[0])              # (N, D) fp32
    o_ref[...] = jnp.dot(r.astype(jnp.bfloat16), proj_ref[...],
                         preferred_element_type=jnp.float32)


def text_pool_project(x_eot, gamma, beta, proj_bf16):
    N, D = x_eot.shape
    E = proj_bf16.shape[1]
    return pl.pallas_call(
        _pool_project_kernel,
        out_shape=jax.ShapeDtypeStruct((N, E), jnp.float32),
        compiler_params=pltpu.CompilerParams(vmem_limit_bytes=VMEM_LIMIT),
    )(x_eot, gamma, beta, proj_bf16)


# ----------------------------------------------------------------------------
# Parameter init (deterministic, mirrors TextEncoder.init() stds) + bf16 cast
# ----------------------------------------------------------------------------
def init_params(key, *, vocab, L, D, H, layers, E):
    attn_std = D ** -0.5
    proj_std = (D ** -0.5) * ((2 * layers) ** -0.5)
    fc_std = (2 * D) ** -0.5
    keys = iter(jax.random.split(key, 3 + 4 * layers))
    params = {
        "tok_emb": jax.random.normal(next(keys), (vocab, D), jnp.float32) * 0.02,
        "pos_emb": jax.random.normal(next(keys), (L, D), jnp.float32) * 0.01,
        "proj":    jax.random.normal(next(keys), (D, E), jnp.float32) * attn_std,
        "ln_f_g":  jnp.ones((1, D), jnp.float32),
        "ln_f_b":  jnp.zeros((1, D), jnp.float32),
        "blocks":  [],
    }
    for _ in range(layers):
        params["blocks"].append((
            jnp.ones((1, D), jnp.float32),                                      # ln1 g
            jnp.zeros((1, D), jnp.float32),                                     # ln1 b
            jax.random.normal(next(keys), (D, 3 * D), jnp.float32) * attn_std,  # Wqkv^T
            jnp.zeros((1, 3 * D), jnp.float32),                                 # bqkv
            jax.random.normal(next(keys), (D, D), jnp.float32) * proj_std,      # Wout^T
            jnp.zeros((1, D), jnp.float32),                                     # bout
            jnp.ones((1, D), jnp.float32),                                      # ln2 g
            jnp.zeros((1, D), jnp.float32),                                     # ln2 b
            jax.random.normal(next(keys), (D, 4 * D), jnp.float32) * fc_std,    # Wfc^T
            jnp.zeros((1, 4 * D), jnp.float32),                                 # bfc
            jax.random.normal(next(keys), (4 * D, D), jnp.float32) * proj_std,  # Wproj^T
            jnp.zeros((1, D), jnp.float32),                                     # bproj
        ))
    return params


def to_kernel_params(params):
    """Cast matmul weights to bf16 (MXU operands, half the VMEM footprint);
    biases, LayerNorm params and embeddings stay fp32."""
    bf = lambda w: w.astype(jnp.bfloat16)
    kp = dict(params)
    kp["proj"] = bf(params["proj"])
    kp["blocks"] = []
    for (ln1g, ln1b, wqkv, bqkv, wout, bout,
         ln2g, ln2b, wfc, bfc, wproj, bproj) in params["blocks"]:
        kp["blocks"].append((ln1g, ln1b, bf(wqkv), bqkv, bf(wout), bout,
                             ln2g, ln2b, bf(wfc), bfc, bf(wproj), bproj))
    return kp


# ----------------------------------------------------------------------------
# Full TextEncoder forward (Pallas path)
# ----------------------------------------------------------------------------
def text_encoder_forward(text, kparams, *, H, return_without_proj=False):
    # glue: embedding gather + positional embedding (not the hot path)
    x = kparams["tok_emb"][text] + kparams["pos_emb"][None]        # (N, L, D)
    N, L, D = x.shape
    Bt = _batch_tile(N)
    for blk in kparams["blocks"]:
        x = residual_block(x, blk, H=H, Bt=Bt)
    # EOT token = max token id (CLIP convention); gather its row per batch
    eot = jnp.argmax(text, axis=-1)
    x_eot = x[jnp.arange(N), eot]                                  # (N, D) glue gather
    o = text_pool_project(x_eot, kparams["ln_f_g"], kparams["ln_f_b"],
                          kparams["proj"])
    if return_without_proj:
        return o, x
    return o


# ----------------------------------------------------------------------------
# Pure-JAX reference for validation.  Matmul weights are rounded through bf16
# to mirror the kernel's weight precision (activations stay fp32 here), so the
# comparison isolates kernel correctness rather than bf16 weight quantization.
# ----------------------------------------------------------------------------
def reference_forward(text, params, *, H):
    qw = lambda w: w.astype(jnp.bfloat16).astype(jnp.float32)
    D = params["tok_emb"].shape[1]
    hd = D // H
    x = params["tok_emb"][text] + params["pos_emb"][None]
    N, L, _ = x.shape
    mask = jnp.where(jnp.triu(jnp.ones((L, L), bool), 1), -1e9, 0.0).astype(jnp.float32)
    for (ln1g, ln1b, wqkv, bqkv, wout, bout,
         ln2g, ln2b, wfc, bfc, wproj, bproj) in params["blocks"]:
        h = _layernorm(x, ln1g[0], ln1b[0])
        qkv = h @ qw(wqkv) + bqkv[0]
        q, k, v = jnp.split(qkv, 3, axis=-1)
        q = q.reshape(N, L, H, hd).transpose(0, 2, 1, 3)
        k = k.reshape(N, L, H, hd).transpose(0, 2, 1, 3)
        v = v.reshape(N, L, H, hd).transpose(0, 2, 1, 3)
        s = jnp.einsum("nhqd,nhkd->nhqk", q, k) / math.sqrt(hd) + mask
        p = jax.nn.softmax(s, axis=-1)
        a = jnp.einsum("nhqk,nhkd->nhqd", p, v).transpose(0, 2, 1, 3).reshape(N, L, D)
        x = x + a @ qw(wout) + bout[0]
        h2 = _layernorm(x, ln2g[0], ln2b[0])
        f = h2 @ qw(wfc) + bfc[0]
        f = f * jax.nn.sigmoid(1.702 * f)
        x = x + f @ qw(wproj) + bproj[0]
    xn = _layernorm(x, params["ln_f_g"][0], params["ln_f_b"][0])
    eot = jnp.argmax(text, axis=-1)
    return xn[jnp.arange(N), eot] @ qw(params["proj"])


if __name__ == "__main__":
    # small, module-consistent shapes
    N, L, D, H, layers, E, vocab = 2, 8, 64, 8, 2, 32, 64

    key = jax.random.PRNGKey(0)
    pkey, tkey = jax.random.split(key)
    params = init_params(pkey, vocab=vocab, L=L, D=D, H=H, layers=layers, E=E)
    kparams = to_kernel_params(params)
    text = jax.random.randint(tkey, (N, L), 0, vocab, dtype=jnp.int32)

    fwd = jax.jit(partial(text_encoder_forward, H=H))
    out = jax.block_until_ready(fwd(text, kparams))

    ref = reference_forward(text, params, H=H)
    np.testing.assert_allclose(np.asarray(out), np.asarray(ref), rtol=2e-2, atol=2e-2)

    print("KERNEL_OK")
</pallas_src>

<mosaic_0001>
module attributes {stable_mosaic.version = 11 : i64} {
  func.func @_block_kernel(%arg0: i32, %arg1: memref<2x8x64xf32, #tpu.memory_space<vmem>>, %arg2: memref<1x64xf32, #tpu.memory_space<vmem>>, %arg3: memref<1x64xf32, #tpu.memory_space<vmem>>, %arg4: memref<64x192xbf16, #tpu.memory_space<vmem>>, %arg5: memref<1x192xf32, #tpu.memory_space<vmem>>, %arg6: memref<64x64xbf16, #tpu.memory_space<vmem>>, %arg7: memref<1x64xf32, #tpu.memory_space<vmem>>, %arg8: memref<1x64xf32, #tpu.memory_space<vmem>>, %arg9: memref<1x64xf32, #tpu.memory_space<vmem>>, %arg10: memref<64x256xbf16, #tpu.memory_space<vmem>>, %arg11: memref<1x256xf32, #tpu.memory_space<vmem>>, %arg12: memref<256x64xbf16, #tpu.memory_space<vmem>>, %arg13: memref<1x64xf32, #tpu.memory_space<vmem>>, %arg14: memref<2x8x64xf32, #tpu.memory_space<vmem>>) attributes {dimension_semantics = [#tpu.dimension_semantics<parallel>], iteration_bounds = array<i64: 1>, scalar_prefetch = 0 : i64, scratch_operands = 0 : i64, tpu.core_type = #tpu.core_type<tc>, window_params = [{transform_indices = @transform_0, window_bounds = array<i64: 2, 8, 64>}, {pipeline_mode = #tpu.pipeline_mode<synchronous>, transform_indices = @transform_1, window_bounds = array<i64: 1, 64>}, {pipeline_mode = #tpu.pipeline_mode<synchronous>, transform_indices = @transform_2, window_bounds = array<i64: 1, 64>}, {pipeline_mode = #tpu.pipeline_mode<synchronous>, transform_indices = @transform_3, window_bounds = array<i64: 64, 192>}, {pipeline_mode = #tpu.pipeline_mode<synchronous>, transform_indices = @transform_4, window_bounds = array<i64: 1, 192>}, {pipeline_mode = #tpu.pipeline_mode<synchronous>, transform_indices = @transform_5, window_bounds = array<i64: 64, 64>}, {pipeline_mode = #tpu.pipeline_mode<synchronous>, transform_indices = @transform_6, window_bounds = array<i64: 1, 64>}, {pipeline_mode = #tpu.pipeline_mode<synchronous>, transform_indices = @transform_7, window_bounds = array<i64: 1, 64>}, {pipeline_mode = #tpu.pipeline_mode<synchronous>, transform_indices = @transform_8, window_bounds = array<i64: 1, 64>}, {pipeline_mode = #tpu.pipeline_mode<synchronous>, transform_indices = @transform_9, window_bounds = array<i64: 64, 256>}, {pipeline_mode = #tpu.pipeline_mode<synchronous>, transform_indices = @transform_10, window_bounds = array<i64: 1, 256>}, {pipeline_mode = #tpu.pipeline_mode<synchronous>, transform_indices = @transform_11, window_bounds = array<i64: 256, 64>}, {pipeline_mode = #tpu.pipeline_mode<synchronous>, transform_indices = @transform_12, window_bounds = array<i64: 1, 64>}, {transform_indices = @transform_13, window_bounds = array<i64: 2, 8, 64>}]} {
    %c0 = arith.constant 0 : index
    %c0_0 = arith.constant 0 : index
    %c0_1 = arith.constant 0 : index
    %0 = vector.load %arg1[%c0, %c0_0, %c0_1] : memref<2x8x64xf32, #tpu.memory_space<vmem>>, vector<2x8x64xf32>
    %1 = vector.shape_cast %0 : vector<2x8x64xf32> to vector<16x64xf32>
    %c0_2 = arith.constant 0 : index
    %c0_3 = arith.constant 0 : index
    %2 = vector.load %arg2[%c0_2, %c0_3] : memref<1x64xf32, #tpu.memory_space<vmem>>, vector<1x64xf32>
    %3 = vector.shape_cast %2 : vector<1x64xf32> to vector<64xf32>
    %c0_4 = arith.constant 0 : index
    %c0_5 = arith.constant 0 : index
    %4 = vector.load %arg3[%c0_4, %c0_5] : memref<1x64xf32, #tpu.memory_space<vmem>>, vector<1x64xf32>
    %5 = vector.shape_cast %4 : vector<1x64xf32> to vector<64xf32>
    %cst = arith.constant dense<0.000000e+00> : vector<16xf32>
    %6 = vector.multi_reduction <add>, %1, %cst [1] : vector<16x64xf32> to vector<16xf32>
    %7 = vector.shape_cast %6 : vector<16xf32> to vector<16x1xf32>
    %cst_6 = arith.constant 6.400000e+01 : f32
    %8 = vector.broadcast %cst_6 : f32 to vector<16x1xf32>
    %9 = arith.divf %7, %8 : vector<16x1xf32>
    %10 = vector.broadcast %9 : vector<16x1xf32> to vector<16x64xf32>
    %11 = arith.subf %1, %10 : vector<16x64xf32>
    %12 = arith.mulf %11, %11 : vector<16x64xf32>
    %cst_7 = arith.constant dense<0.000000e+00> : vector<16xf32>
    %13 = vector.multi_reduction <add>, %12, %cst_7 [1] : vector<16x64xf32> to vector<16xf32>
    %14 = vector.shape_cast %13 : vector<16xf32> to vector<16x1xf32>
    %cst_8 = arith.constant 6.400000e+01 : f32
    %15 = vector.broadcast %cst_8 : f32 to vector<16x1xf32>
    %16 = arith.divf %14, %15 : vector<16x1xf32>
    %17 = vector.broadcast %9 : vector<16x1xf32> to vector<16x64xf32>
    %18 = arith.subf %1, %17 : vector<16x64xf32>
    %cst_9 = arith.constant 9.99999974E-6 : f32
    %19 = vector.broadcast %cst_9 : f32 to vector<16x1xf32>
    %20 = arith.addf %16, %19 : vector<16x1xf32>
    %21 = math.rsqrt %20 : vector<16x1xf32>
    %22 = vector.broadcast %21 : vector<16x1xf32> to vector<16x64xf32>
    %23 = arith.mulf %18, %22 : vector<16x64xf32>
    %24 = vector.shape_cast %3 : vector<64xf32> to vector<1x64xf32>
    %25 = vector.broadcast %24 : vector<1x64xf32> to vector<16x64xf32>
    %26 = arith.mulf %23, %25 : vector<16x64xf32>
    %27 = vector.shape_cast %5 : vector<64xf32> to vector<1x64xf32>
    %28 = vector.broadcast %27 : vector<1x64xf32> to vector<16x64xf32>
    %29 = arith.addf %26, %28 : vector<16x64xf32>
    %30 = arith.truncf %29 : vector<16x64xf32> to vector<16x64xbf16>
    %c0_10 = arith.constant 0 : index
    %c0_11 = arith.constant 0 : index
    %31 = vector.load %arg4[%c0_10, %c0_11] : memref<64x192xbf16, #tpu.memory_space<vmem>>, vector<64x192xbf16>
    %cst_12 = arith.constant dense<0.000000e+00> : vector<16x192xf32>
    %32 = tpu.matmul %30, %31, %cst_12 {dimension_numbers = #tpu.dot_dimension_numbers<[1], [0], [0], [1], [0, 0, 1, 1], [], []>} : vector<16x64xbf16>, vector<64x192xbf16>, vector<16x192xf32> -> vector<16x192xf32>
    %c0_13 = arith.constant 0 : index
    %c0_14 = arith.constant 0 : index
    %33 = vector.load %arg5[%c0_13, %c0_14] : memref<1x192xf32, #tpu.memory_space<vmem>>, vector<1x192xf32>
    %34 = vector.shape_cast %33 : vector<1x192xf32> to vector<192xf32>
    %35 = vector.shape_cast %34 : vector<192xf32> to vector<1x192xf32>
    %36 = vector.broadcast %35 : vector<1x192xf32> to vector<16x192xf32>
    %37 = arith.addf %32, %36 : vector<16x192xf32>
    %38 = arith.truncf %37 : vector<16x192xf32> to vector<16x192xbf16>
    %39 = vector.extract_strided_slice %38 {offsets = [0, 0], sizes = [16, 8], strides = [1, 1]} : vector<16x192xbf16> to vector<16x8xbf16>
    %40 = vector.shape_cast %39 : vector<16x8xbf16> to vector<2x8x8xbf16>
    %41 = vector.extract_strided_slice %38 {offsets = [0, 8], sizes = [16, 8], strides = [1, 1]} : vector<16x192xbf16> to vector<16x8xbf16>
    %42 = vector.shape_cast %41 : vector<16x8xbf16> to vector<2x8x8xbf16>
    %43 = vector.extract_strided_slice %38 {offsets = [0, 16], sizes = [16, 8], strides = [1, 1]} : vector<16x192xbf16> to vector<16x8xbf16>
    %44 = vector.shape_cast %43 : vector<16x8xbf16> to vector<2x8x8xbf16>
    %45 = vector.extract_strided_slice %38 {offsets = [0, 24], sizes = [16, 8], strides = [1, 1]} : vector<16x192xbf16> to vector<16x8xbf16>
    %46 = vector.shape_cast %45 : vector<16x8xbf16> to vector<2x8x8xbf16>
    %47 = vector.extract_strided_slice %38 {offsets = [0, 32], sizes = [16, 8], strides = [1, 1]} : vector<16x192xbf16> to vector<16x8xbf16>
    %48 = vector.shape_cast %47 : vector<16x8xbf16> to vector<2x8x8xbf16>
    %49 = vector.extract_strided_slice %38 {offsets = [0, 40], sizes = [16, 8], strides = [1, 1]} : vector<16x192xbf16> to vector<16x8xbf16>
    %50 = vector.shape_cast %49 : vector<16x8xbf16> to vector<2x8x8xbf16>
    %51 = vector.extract_strided_slice %38 {offsets = [0, 48], sizes = [16, 8], strides = [1, 1]} : vector<16x192xbf16> to vector<16x8xbf16>
    %52 = vector.shape_cast %51 : vector<16x8xbf16> to vector<2x8x8xbf16>
    %53 = vector.extract_strided_slice %38 {offsets = [0, 56], sizes = [16, 8], strides = [1, 1]} : vector<16x192xbf16> to vector<16x8xbf16>
    %54 = vector.shape_cast %53 : vector<16x8xbf16> to vector<2x8x8xbf16>
    %55 = vector.shape_cast %40 : vector<2x8x8xbf16> to vector<1x2x8x8xbf16>
    %56 = vector.shape_cast %42 : vector<2x8x8xbf16> to vector<1x2x8x8xbf16>
    %57 = vector.shape_cast %44 : vector<2x8x8xbf16> to vector<1x2x8x8xbf16>
    %58 = vector.shape_cast %46 : vector<2x8x8xbf16> to vector<1x2x8x8xbf16>
    %59 = vector.shape_cast %48 : vector<2x8x8xbf16> to vector<1x2x8x8xbf16>
    %60 = vector.shape_cast %50 : vector<2x8x8xbf16> to vector<1x2x8x8xbf16>
    %61 = vector.shape_cast %52 : vector<2x8x8xbf16> to vector<1x2x8x8xbf16>
    %62 = vector.shape_cast %54 : vector<2x8x8xbf16> to vector<1x2x8x8xbf16>
    %63 = tpu.concatenate %55, %56, %57, %58, %59, %60, %61, %62 in 0 : vector<1x2x8x8xbf16>, vector<1x2x8x8xbf16>, vector<1x2x8x8xbf16>, vector<1x2x8x8xbf16>, vector<1x2x8x8xbf16>, vector<1x2x8x8xbf16>, vector<1x2x8x8xbf16>, vector<1x2x8x8xbf16> -> vector<8x2x8x8xbf16>
    %64 = vector.shape_cast %63 : vector<8x2x8x8xbf16> to vector<16x8x8xbf16>
    %65 = vector.extract_strided_slice %38 {offsets = [0, 64], sizes = [16, 8], strides = [1, 1]} : vector<16x192xbf16> to vector<16x8xbf16>
    %66 = vector.shape_cast %65 : vector<16x8xbf16> to vector<2x8x8xbf16>
    %67 = vector.extract_strided_slice %38 {offsets = [0, 72], sizes = [16, 8], strides = [1, 1]} : vector<16x192xbf16> to vector<16x8xbf16>
    %68 = vector.shape_cast %67 : vector<16x8xbf16> to vector<2x8x8xbf16>
    %69 = vector.extract_strided_slice %38 {offsets = [0, 80], sizes = [16, 8], strides = [1, 1]} : vector<16x192xbf16> to vector<16x8xbf16>
    %70 = vector.shape_cast %69 : vector<16x8xbf16> to vector<2x8x8xbf16>
    %71 = vector.extract_strided_slice %38 {offsets = [0, 88], sizes = [16, 8], strides = [1, 1]} : vector<16x192xbf16> to vector<16x8xbf16>
    %72 = vector.shape_cast %71 : vector<16x8xbf16> to vector<2x8x8xbf16>
    %73 = vector.extract_strided_slice %38 {offsets = [0, 96], sizes = [16, 8], strides = [1, 1]} : vector<16x192xbf16> to vector<16x8xbf16>
    %74 = vector.shape_cast %73 : vector<16x8xbf16> to vector<2x8x8xbf16>
    %75 = vector.extract_strided_slice %38 {offsets = [0, 104], sizes = [16, 8], strides = [1, 1]} : vector<16x192xbf16> to vector<16x8xbf16>
    %76 = vector.shape_cast %75 : vector<16x8xbf16> to vector<2x8x8xbf16>
    %77 = vector.extract_strided_slice %38 {offsets = [0, 112], sizes = [16, 8], strides = [1, 1]} : vector<16x192xbf16> to vector<16x8xbf16>
    %78 = vector.shape_cast %77 : vector<16x8xbf16> to vector<2x8x8xbf16>
    %79 = vector.extract_strided_slice %38 {offsets = [0, 120], sizes = [16, 8], strides = [1, 1]} : vector<16x192xbf16> to vector<16x8xbf16>
    %80 = vector.shape_cast %79 : vector<16x8xbf16> to vector<2x8x8xbf16>
    %81 = vector.shape_cast %66 : vector<2x8x8xbf16> to vector<1x2x8x8xbf16>
    %82 = vector.shape_cast %68 : vector<2x8x8xbf16> to vector<1x2x8x8xbf16>
    %83 = vector.shape_cast %70 : vector<2x8x8xbf16> to vector<1x2x8x8xbf16>
    %84 = vector.shape_cast %72 : vector<2x8x8xbf16> to vector<1x2x8x8xbf16>
    %85 = vector.shape_cast %74 : vector<2x8x8xbf16> to vector<1x2x8x8xbf16>
    %86 = vector.shape_cast %76 : vector<2x8x8xbf16> to vector<1x2x8x8xbf16>
    %87 = vector.shape_cast %78 : vector<2x8x8xbf16> to vector<1x2x8x8xbf16>
    %88 = vector.shape_cast %80 : vector<2x8x8xbf16> to vector<1x2x8x8xbf16>
    %89 = tpu.concatenate %81, %82, %83, %84, %85, %86, %87, %88 in 0 : vector<1x2x8x8xbf16>, vector<1x2x8x8xbf16>, vector<1x2x8x8xbf16>, vector<1x2x8x8xbf16>, vector<1x2x8x8xbf16>, vector<1x2x8x8xbf16>, vector<1x2x8x8xbf16>, vector<1x2x8x8xbf16> -> vector<8x2x8x8xbf16>
    %90 = vector.shape_cast %89 : vector<8x2x8x8xbf16> to vector<16x8x8xbf16>
    %91 = vector.extract_strided_slice %38 {offsets = [0, 128], sizes = [16, 8], strides = [1, 1]} : vector<16x192xbf16> to vector<16x8xbf16>
    %92 = vector.shape_cast %91 : vector<16x8xbf16> to vector<2x8x8xbf16>
    %93 = vector.extract_strided_slice %38 {offsets = [0, 136], sizes = [16, 8], strides = [1, 1]} : vector<16x192xbf16> to vector<16x8xbf16>
    %94 = vector.shape_cast %93 : vector<16x8xbf16> to vector<2x8x8xbf16>
    %95 = vector.extract_strided_slice %38 {offsets = [0, 144], sizes = [16, 8], strides = [1, 1]} : vector<16x192xbf16> to vector<16x8xbf16>
    %96 = vector.shape_cast %95 : vector<16x8xbf16> to vector<2x8x8xbf16>
    %97 = vector.extract_strided_slice %38 {offsets = [0, 152], sizes = [16, 8], strides = [1, 1]} : vector<16x192xbf16> to vector<16x8xbf16>
    %98 = vector.shape_cast %97 : vector<16x8xbf16> to vector<2x8x8xbf16>
    %99 = vector.extract_strided_slice %38 {offsets = [0, 160], sizes = [16, 8], strides = [1, 1]} : vector<16x192xbf16> to vector<16x8xbf16>
    %100 = vector.shape_cast %99 : vector<16x8xbf16> to vector<2x8x8xbf16>
    %101 = vector.extract_strided_slice %38 {offsets = [0, 168], sizes = [16, 8], strides = [1, 1]} : vector<16x192xbf16> to vector<16x8xbf16>
    %102 = vector.shape_cast %101 : vector<16x8xbf16> to vector<2x8x8xbf16>
    %103 = vector.extract_strided_slice %38 {offsets = [0, 176], sizes = [16, 8], strides = [1, 1]} : vector<16x192xbf16> to vector<16x8xbf16>
    %104 = vector.shape_cast %103 : vector<16x8xbf16> to vector<2x8x8xbf16>
    %105 = vector.extract_strided_slice %38 {offsets = [0, 184], sizes = [16, 8], strides = [1, 1]} : vector<16x192xbf16> to vector<16x8xbf16>
    %106 = vector.shape_cast %105 : vector<16x8xbf16> to vector<2x8x8xbf16>
    %107 = vector.shape_cast %92 : vector<2x8x8xbf16> to vector<1x2x8x8xbf16>
    %108 = vector.shape_cast %94 : vector<2x8x8xbf16> to vector<1x2x8x8xbf16>
    %109 = vector.shape_cast %96 : vector<2x8x8xbf16> to vector<1x2x8x8xbf16>
    %110 = vector.shape_cast %98 : vector<2x8x8xbf16> to vector<1x2x8x8xbf16>
    %111 = vector.shape_cast %100 : vector<2x8x8xbf16> to vector<1x2x8x8xbf16>
    %112 = vector.shape_cast %102 : vector<2x8x8xbf16> to vector<1x2x8x8xbf16>
    %113 = vector.shape_cast %104 : vector<2x8x8xbf16> to vector<1x2x8x8xbf16>
    %114 = vector.shape_cast %106 : vector<2x8x8xbf16> to vector<1x2x8x8xbf16>
    %115 = tpu.concatenate %107, %108, %109, %110, %111, %112, %113, %114 in 0 : vector<1x2x8x8xbf16>, vector<1x2x8x8xbf16>, vector<1x2x8x8xbf16>, vector<1x2x8x8xbf16>, vector<1x2x8x8xbf16>, vector<1x2x8x8xbf16>, vector<1x2x8x8xbf16>, vector<1x2x8x8xbf16> -> vector<8x2x8x8xbf16>
    %116 = vector.shape_cast %115 : vector<8x2x8x8xbf16> to vector<16x8x8xbf16>
    %117 = tpu.iota {dimensions = array<i32: 0>} : vector<8x8xi32>
    %118 = tpu.iota {dimensions = array<i32: 1>} : vector<8x8xi32>
    %119 = arith.cmpi sgt, %118, %117 : vector<8x8xi32>
    %cst_15 = arith.constant -1.000000e+09 : f32
    %cst_16 = arith.constant 0.000000e+00 : f32
    %120 = vector.broadcast %cst_15 : f32 to vector<8x8xf32>
    %121 = vector.broadcast %cst_16 : f32 to vector<8x8xf32>
    %122 = arith.select %119, %120, %121 : vector<8x8xi1>, vector<8x8xf32>
    "tpu.trace_start"() <{level = 10 : i32, message = "gqd,gkd->gqk"}> : () -> ()
    %cst_17 = arith.constant dense<0.000000e+00> : vector<16x8x8xf32>
    %123 = tpu.matmul %64, %90, %cst_17 {dimension_numbers = #tpu.dot_dimension_numbers<[2], [2], [1], [1], [0, 0, 0, 1, 1, 1], [0], [0]>} : vector<16x8x8xbf16>, vector<16x8x8xbf16>, vector<16x8x8xf32> -> vector<16x8x8xf32>
    "tpu.trace_stop"() : () -> ()
    %cst_18 = arith.constant 0.353553385 : f32
    %124 = vector.broadcast %cst_18 : f32 to vector<16x8x8xf32>
    %125 = arith.mulf %123, %124 : vector<16x8x8xf32>
    %126 = vector.shape_cast %122 : vector<8x8xf32> to vector<1x8x8xf32>
    %127 = vector.broadcast %126 : vector<1x8x8xf32> to vector<16x8x8xf32>
    %128 = arith.addf %125, %127 : vector<16x8x8xf32>
    %cst_19 = arith.constant dense<0xFF800000> : vector<16x8xf32>
    %129 = vector.multi_reduction <maximumf>, %128, %cst_19 [2] : vector<16x8x8xf32> to vector<16x8xf32>
    %130 = vector.shape_cast %129 : vector<16x8xf32> to vector<16x8x1xf32>
    %131 = vector.broadcast %130 : vector<16x8x1xf32> to vector<16x8x8xf32>
    %132 = arith.subf %128, %131 : vector<16x8x8xf32>
    %133 = math.exp %132 : vector<16x8x8xf32>
    %cst_20 = arith.constant dense<0.000000e+00> : vector<16x8xf32>
    %134 = vector.multi_reduction <add>, %133, %cst_20 [2] : vector<16x8x8xf32> to vector<16x8xf32>
    %135 = vector.shape_cast %134 : vector<16x8xf32> to vector<16x8x1xf32>
    %136 = tpu.reciprocal %135 {approx = true} : vector<16x8x1xf32> -> vector<16x8x1xf32>
    %137 = vector.broadcast %136 : vector<16x8x1xf32> to vector<16x8x8xf32>
    %138 = arith.mulf %133, %137 : vector<16x8x8xf32>
    %139 = arith.truncf %138 : vector<16x8x8xf32> to vector<16x8x8xbf16>
    "tpu.trace_start"() <{level = 10 : i32, message = "gqk,gkd->gqd"}> : () -> ()
    %cst_21 = arith.constant dense<0.000000e+00> : vector<16x8x8xf32>
    %140 = tpu.matmul %139, %116, %cst_21 {dimension_numbers = #tpu.dot_dimension_numbers<[2], [1], [1], [2], [0, 0, 0, 1, 1, 2], [0], [0]>} : vector<16x8x8xbf16>, vector<16x8x8xbf16>, vector<16x8x8xf32> -> vector<16x8x8xf32>
    "tpu.trace_stop"() : () -> ()
    %141 = vector.shape_cast %140 : vector<16x8x8xf32> to vector<8x16x8xf32>
    %142 = vector.extract_strided_slice %141 {offsets = [0, 0, 0], sizes = [1, 16, 8], strides = [1, 1, 1]} : vector<8x16x8xf32> to vector<1x16x8xf32>
    %143 = vector.shape_cast %142 : vector<1x16x8xf32> to vector<16x8xf32>
    %144 = vector.extract_strided_slice %141 {offsets = [1, 0, 0], sizes = [1, 16, 8], strides = [1, 1, 1]} : vector<8x16x8xf32> to vector<1x16x8xf32>
    %145 = vector.shape_cast %144 : vector<1x16x8xf32> to vector<16x8xf32>
    %146 = vector.extract_strided_slice %141 {offsets = [2, 0, 0], sizes = [1, 16, 8], strides = [1, 1, 1]} : vector<8x16x8xf32> to vector<1x16x8xf32>
    %147 = vector.shape_cast %146 : vector<1x16x8xf32> to vector<16x8xf32>
    %148 = vector.extract_strided_slice %141 {offsets = [3, 0, 0], sizes = [1, 16, 8], strides = [1, 1, 1]} : vector<8x16x8xf32> to vector<1x16x8xf32>
    %149 = vector.shape_cast %148 : vector<1x16x8xf32> to vector<16x8xf32>
    %150 = vector.extract_strided_slice %141 {offsets = [4, 0, 0], sizes = [1, 16, 8], strides = [1, 1, 1]} : vector<8x16x8xf32> to vector<1x16x8xf32>
    %151 = vector.shape_cast %150 : vector<1x16x8xf32> to vector<16x8xf32>
    %152 = vector.extract_strided_slice %141 {offsets = [5, 0, 0], sizes = [1, 16, 8], strides = [1, 1, 1]} : vector<8x16x8xf32> to vector<1x16x8xf32>
    %153 = vector.shape_cast %152 : vector<1x16x8xf32> to vector<16x8xf32>
    %154 = vector.extract_strided_slice %141 {offsets = [6, 0, 0], sizes = [1, 16, 8], strides = [1, 1, 1]} : vector<8x16x8xf32> to vector<1x16x8xf32>
    %155 = vector.shape_cast %154 : vector<1x16x8xf32> to vector<16x8xf32>
    %156 = vector.extract_strided_slice %141 {offsets = [7, 0, 0], sizes = [1, 16, 8], strides = [1, 1, 1]} : vector<8x16x8xf32> to vector<1x16x8xf32>
    %157 = vector.shape_cast %156 : vector<1x16x8xf32> to vector<16x8xf32>
    %158 = tpu.concatenate %143, %145, %147, %149, %151, %153, %155, %157 in 1 : vector<16x8xf32>, vector<16x8xf32>, vector<16x8xf32>, vector<16x8xf32>, vector<16x8xf32>, vector<16x8xf32>, vector<16x8xf32>, vector<16x8xf32> -> vector<16x64xf32>
    %159 = arith.truncf %158 : vector<16x64xf32> to vector<16x64xbf16>
    %c0_22 = arith.constant 0 : index
    %c0_23 = arith.constant 0 : index
    %160 = vector.load %arg6[%c0_22, %c0_23] : memref<64x64xbf16, #tpu.memory_space<vmem>>, vector<64x64xbf16>
    %cst_24 = arith.constant dense<0.000000e+00> : vector<16x64xf32>
    %161 = tpu.matmul %159, %160, %cst_24 {dimension_numbers = #tpu.dot_dimension_numbers<[1], [0], [0], [1], [0, 0, 1, 1], [], []>} : vector<16x64xbf16>, vector<64x64xbf16>, vector<16x64xf32> -> vector<16x64xf32>
    %c0_25 = arith.constant 0 : index
    %c0_26 = arith.constant 0 : index
    %162 = vector.load %arg7[%c0_25, %c0_26] : memref<1x64xf32, #tpu.memory_space<vmem>>, vector<1x64xf32>
    %163 = vector.shape_cast %162 : vector<1x64xf32> to vector<64xf32>
    %164 = vector.shape_cast %163 : vector<64xf32> to vector<1x64xf32>
    %165 = vector.broadcast %164 : vector<1x64xf32> to vector<16x64xf32>
    %166 = arith.addf %161, %165 : vector<16x64xf32>
    %167 = arith.addf %1, %166 : vector<16x64xf32>
    %c0_27 = arith.constant 0 : index
    %c0_28 = arith.constant 0 : index
    %168 = vector.load %arg8[%c0_27, %c0_28] : memref<1x64xf32, #tpu.memory_space<vmem>>, vector<1x64xf32>
    %169 = vector.shape_cast %168 : vector<1x64xf32> to vector<64xf32>
    %c0_29 = arith.constant 0 : index
    %c0_30 = arith.constant 0 : index
    %170 = vector.load %arg9[%c0_29, %c0_30] : memref<1x64xf32, #tpu.memory_space<vmem>>, vector<1x64xf32>
    %171 = vector.shape_cast %170 : vector<1x64xf32> to vector<64xf32>
    %cst_31 = arith.constant dense<0.000000e+00> : vector<16xf32>
    %172 = vector.multi_reduction <add>, %167, %cst_31 [1] : vector<16x64xf32> to vector<16xf32>
    %173 = vector.shape_cast %172 : vector<16xf32> to vector<16x1xf32>
    %cst_32 = arith.constant 6.400000e+01 : f32
    %174 = vector.broadcast %cst_32 : f32 to vector<16x1xf32>
    %175 = arith.divf %173, %174 : vector<16x1xf32>
    %176 = vector.broadcast %175 : vector<16x1xf32> to vector<16x64xf32>
    %177 = arith.subf %167, %176 : vector<16x64xf32>
    %178 = arith.mulf %177, %177 : vector<16x64xf32>
    %cst_33 = arith.constant dense<0.000000e+00> : vector<16xf32>
    %179 = vector.multi_reduction <add>, %178, %cst_33 [1] : vector<16x64xf32> to vector<16xf32>
    %180 = vector.shape_cast %179 : vector<16xf32> to vector<16x1xf32>
    %cst_34 = arith.constant 6.400000e+01 : f32
    %181 = vector.broadcast %cst_34 : f32 to vector<16x1xf32>
    %182 = arith.divf %180, %181 : vector<16x1xf32>
    %183 = vector.broadcast %175 : vector<16x1xf32> to vector<16x64xf32>
    %184 = arith.subf %167, %183 : vector<16x64xf32>
    %cst_35 = arith.constant 9.99999974E-6 : f32
    %185 = vector.broadcast %cst_35 : f32 to vector<16x1xf32>
    %186 = arith.addf %182, %185 : vector<16x1xf32>
    %187 = math.rsqrt %186 : vector<16x1xf32>
    %188 = vector.broadcast %187 : vector<16x1xf32> to vector<16x64xf32>
    %189 = arith.mulf %184, %188 : vector<16x64xf32>
    %190 = vector.shape_cast %169 : vector<64xf32> to vector<1x64xf32>
    %191 = vector.broadcast %190 : vector<1x64xf32> to vector<16x64xf32>
    %192 = arith.mulf %189, %191 : vector<16x64xf32>
    %193 = vector.shape_cast %171 : vector<64xf32> to vector<1x64xf32>
    %194 = vector.broadcast %193 : vector<1x64xf32> to vector<16x64xf32>
    %195 = arith.addf %192, %194 : vector<16x64xf32>
    %196 = arith.truncf %195 : vector<16x64xf32> to vector<16x64xbf16>
    %c0_36 = arith.constant 0 : index
    %c0_37 = arith.constant 0 : index
    %197 = vector.load %arg10[%c0_36, %c0_37] : memref<64x256xbf16, #tpu.memory_space<vmem>>, vector<64x256xbf16>
    %cst_38 = arith.constant dense<0.000000e+00> : vector<16x256xf32>
    %198 = tpu.matmul %196, %197, %cst_38 {dimension_numbers = #tpu.dot_dimension_numbers<[1], [0], [0], [1], [0, 0, 1, 1], [], []>} : vector<16x64xbf16>, vector<64x256xbf16>, vector<16x256xf32> -> vector<16x256xf32>
    %c0_39 = arith.constant 0 : index
    %c0_40 = arith.constant 0 : index
    %199 = vector.load %arg11[%c0_39, %c0_40] : memref<1x256xf32, #tpu.memory_space<vmem>>, vector<1x256xf32>
    %200 = vector.shape_cast %199 : vector<1x256xf32> to vector<256xf32>
    %201 = vector.shape_cast %200 : vector<256xf32> to vector<1x256xf32>
    %202 = vector.broadcast %201 : vector<1x256xf32> to vector<16x256xf32>
    %203 = arith.addf %198, %202 : vector<16x256xf32>
    %cst_41 = arith.constant 1.702000e+00 : f32
    %204 = vector.broadcast %cst_41 : f32 to vector<16x256xf32>
    %205 = arith.mulf %204, %203 : vector<16x256xf32>
    %206 = arith.negf %205 : vector<16x256xf32>
    %207 = math.exp %206 : vector<16x256xf32>
    %cst_42 = arith.constant 1.000000e+00 : f32
    %208 = vector.broadcast %cst_42 : f32 to vector<16x256xf32>
    %209 = arith.addf %208, %207 : vector<16x256xf32>
    %210 = arith.divf %208, %209 : vector<16x256xf32>
    %211 = arith.mulf %203, %210 : vector<16x256xf32>
    %212 = arith.truncf %211 : vector<16x256xf32> to vector<16x256xbf16>
    %c0_43 = arith.constant 0 : index
    %c0_44 = arith.constant 0 : index
    %213 = vector.load %arg12[%c0_43, %c0_44] : memref<256x64xbf16, #tpu.memory_space<vmem>>, vector<256x64xbf16>
    %cst_45 = arith.constant dense<0.000000e+00> : vector<16x64xf32>
    %214 = tpu.matmul %212, %213, %cst_45 {dimension_numbers = #tpu.dot_dimension_numbers<[1], [0], [0], [1], [0, 0, 1, 1], [], []>} : vector<16x256xbf16>, vector<256x64xbf16>, vector<16x64xf32> -> vector<16x64xf32>
    %c0_46 = arith.constant 0 : index
    %c0_47 = arith.constant 0 : index
    %215 = vector.load %arg13[%c0_46, %c0_47] : memref<1x64xf32, #tpu.memory_space<vmem>>, vector<1x64xf32>
    %216 = vector.shape_cast %215 : vector<1x64xf32> to vector<64xf32>
    %217 = vector.shape_cast %216 : vector<64xf32> to vector<1x64xf32>
    %218 = vector.broadcast %217 : vector<1x64xf32> to vector<16x64xf32>
    %219 = arith.addf %214, %218 : vector<16x64xf32>
    %220 = arith.addf %167, %219 : vector<16x64xf32>
    %221 = vector.shape_cast %220 : vector<16x64xf32> to vector<2x8x64xf32>
    %c0_48 = arith.constant 0 : index
    %c0_49 = arith.constant 0 : index
    %c0_50 = arith.constant 0 : index
    %222 = vector.load %arg14[%c0_48, %c0_49, %c0_50] : memref<2x8x64xf32, #tpu.memory_space<vmem>>, vector<2x8x64xf32>
    tpu.vector_store %arg14[%c0_48, %c0_49, %c0_50], %221 {strides = array<i32>} : memref<2x8x64xf32, #tpu.memory_space<vmem>>, vector<2x8x64xf32>,
    return
  }
  func.func @transform_0(%arg0: i32) -> (i32, i32, i32) {
    %c0_i32 = arith.constant 0 : i32
    %c0_i32_0 = arith.constant 0 : i32
    %c0_i32_1 = arith.constant 0 : i32
    return %arg0, %c0_i32, %c0_i32_0 : i32, i32, i32
  }
  func.func @transform_1(%arg0: i32) -> (i32, i32) {
    %c0_i32 = arith.constant 0 : i32
    %c0_i32_0 = arith.constant 0 : i32
    %c0_i32_1 = arith.constant 0 : i32
    return %c0_i32, %c0_i32_0 : i32, i32
  }
  func.func @transform_2(%arg0: i32) -> (i32, i32) {
    %c0_i32 = arith.constant 0 : i32
    %c0_i32_0 = arith.constant 0 : i32
    %c0_i32_1 = arith.constant 0 : i32
    return %c0_i32, %c0_i32_0 : i32, i32
  }
  func.func @transform_3(%arg0: i32) -> (i32, i32) {
    %c0_i32 = arith.constant 0 : i32
    %c0_i32_0 = arith.constant 0 : i32
    %c0_i32_1 = arith.constant 0 : i32
    return %c0_i32, %c0_i32_0 : i32, i32
  }
  func.func @transform_4(%arg0: i32) -> (i32, i32) {
    %c0_i32 = arith.constant 0 : i32
    %c0_i32_0 = arith.constant 0 : i32
    %c0_i32_1 = arith.constant 0 : i32
    return %c0_i32, %c0_i32_0 : i32, i32
  }
  func.func @transform_5(%arg0: i32) -> (i32, i32) {
    %c0_i32 = arith.constant 0 : i32
    %c0_i32_0 = arith.constant 0 : i32
    %c0_i32_1 = arith.constant 0 : i32
    return %c0_i32, %c0_i32_0 : i32, i32
  }
  func.func @transform_6(%arg0: i32) -> (i32, i32) {
    %c0_i32 = arith.constant 0 : i32
    %c0_i32_0 = arith.constant 0 : i32
    %c0_i32_1 = arith.constant 0 : i32
    return %c0_i32, %c0_i32_0 : i32, i32
  }
  func.func @transform_7(%arg0: i32) -> (i32, i32) {
    %c0_i32 = arith.constant 0 : i32
    %c0_i32_0 = arith.constant 0 : i32
    %c0_i32_1 = arith.constant 0 : i32
    return %c0_i32, %c0_i32_0 : i32, i32
  }
  func.func @transform_8(%arg0: i32) -> (i32, i32) {
    %c0_i32 = arith.constant 0 : i32
    %c0_i32_0 = arith.constant 0 : i32
    %c0_i32_1 = arith.constant 0 : i32
    return %c0_i32, %c0_i32_0 : i32, i32
  }
  func.func @transform_9(%arg0: i32) -> (i32, i32) {
    %c0_i32 = arith.constant 0 : i32
    %c0_i32_0 = arith.constant 0 : i32
    %c0_i32_1 = arith.constant 0 : i32
    return %c0_i32, %c0_i32_0 : i32, i32
  }
  func.func @transform_10(%arg0: i32) -> (i32, i32) {
    %c0_i32 = arith.constant 0 : i32
    %c0_i32_0 = arith.constant 0 : i32
    %c0_i32_1 = arith.constant 0 : i32
    return %c0_i32, %c0_i32_0 : i32, i32
  }
  func.func @transform_11(%arg0: i32) -> (i32, i32) {
    %c0_i32 = arith.constant 0 : i32
    %c0_i32_0 = arith.constant 0 : i32
    %c0_i32_1 = arith.constant 0 : i32
    return %c0_i32, %c0_i32_0 : i32, i32
  }
  func.func @transform_12(%arg0: i32) -> (i32, i32) {
    %c0_i32 = arith.constant 0 : i32
    %c0_i32_0 = arith.constant 0 : i32
    %c0_i32_1 = arith.constant 0 : i32
    return %c0_i32, %c0_i32_0 : i32, i32
  }
  func.func @transform_13(%arg0: i32) -> (i32, i32, i32) {
    %c0_i32 = arith.constant 0 : i32
    %c0_i32_0 = arith.constant 0 : i32
    %c0_i32_1 = arith.constant 0 : i32
    return %arg0, %c0_i32, %c0_i32_0 : i32, i32, i32
  }
}

module attributes {stable_mosaic.version = 11 : i64} {
  func.func @_pool_project_kernel(%arg0: memref<2x64xf32, #tpu.memory_space<vmem>>, %arg1: memref<1x64xf32, #tpu.memory_space<vmem>>, %arg2: memref<1x64xf32, #tpu.memory_space<vmem>>, %arg3: memref<64x32xbf16, #tpu.memory_space<vmem>>, %arg4: memref<2x32xf32, #tpu.memory_space<vmem>>) attributes {dimension_semantics = [], scalar_prefetch = 0 : i64, scratch_operands = 0 : i64, tpu.core_type = #tpu.core_type<tc>} {
    %c0 = arith.constant 0 : index
    %c0_0 = arith.constant 0 : index
    %0 = vector.load %arg0[%c0, %c0_0] : memref<2x64xf32, #tpu.memory_space<vmem>>, vector<2x64xf32>
    %c0_1 = arith.constant 0 : index
    %c0_2 = arith.constant 0 : index
    %1 = vector.load %arg1[%c0_1, %c0_2] : memref<1x64xf32, #tpu.memory_space<vmem>>, vector<1x64xf32>
    %2 = vector.shape_cast %1 : vector<1x64xf32> to vector<64xf32>
    %c0_3 = arith.constant 0 : index
    %c0_4 = arith.constant 0 : index
    %3 = vector.load %arg2[%c0_3, %c0_4] : memref<1x64xf32, #tpu.memory_space<vmem>>, vector<1x64xf32>
    %4 = vector.shape_cast %3 : vector<1x64xf32> to vector<64xf32>
    %cst = arith.constant dense<0.000000e+00> : vector<2xf32>
    %5 = vector.multi_reduction <add>, %0, %cst [1] : vector<2x64xf32> to vector<2xf32>
    %6 = vector.shape_cast %5 : vector<2xf32> to vector<2x1xf32>
    %cst_5 = arith.constant 6.400000e+01 : f32
    %7 = vector.broadcast %cst_5 : f32 to vector<2x1xf32>
    %8 = arith.divf %6, %7 : vector<2x1xf32>
    %9 = vector.broadcast %8 : vector<2x1xf32> to vector<2x64xf32>
    %10 = arith.subf %0, %9 : vector<2x64xf32>
    %11 = arith.mulf %10, %10 : vector<2x64xf32>
    %cst_6 = arith.constant dense<0.000000e+00> : vector<2xf32>
    %12 = vector.multi_reduction <add>, %11, %cst_6 [1] : vector<2x64xf32> to vector<2xf32>
    %13 = vector.shape_cast %12 : vector<2xf32> to vector<2x1xf32>
    %cst_7 = arith.constant 6.400000e+01 : f32
    %14 = vector.broadcast %cst_7 : f32 to vector<2x1xf32>
    %15 = arith.divf %13, %14 : vector<2x1xf32>
    %16 = vector.broadcast %8 : vector<2x1xf32> to vector<2x64xf32>
    %17 = arith.subf %0, %16 : vector<2x64xf32>
    %cst_8 = arith.constant 9.99999974E-6 : f32
    %18 = vector.broadcast %cst_8 : f32 to vector<2x1xf32>
    %19 = arith.addf %15, %18 : vector<2x1xf32>
    %20 = math.rsqrt %19 : vector<2x1xf32>
    %21 = vector.broadcast %20 : vector<2x1xf32> to vector<2x64xf32>
    %22 = arith.mulf %17, %21 : vector<2x64xf32>
    %23 = vector.shape_cast %2 : vector<64xf32> to vector<1x64xf32>
    %24 = vector.broadcast %23 : vector<1x64xf32> to vector<2x64xf32>
    %25 = arith.mulf %22, %24 : vector<2x64xf32>
    %26 = vector.shape_cast %4 : vector<64xf32> to vector<1x64xf32>
    %27 = vector.broadcast %26 : vector<1x64xf32> to vector<2x64xf32>
    %28 = arith.addf %25, %27 : vector<2x64xf32>
    %29 = arith.truncf %28 : vector<2x64xf32> to vector<2x64xbf16>
    %c0_9 = arith.constant 0 : index
    %c0_10 = arith.constant 0 : index
    %30 = vector.load %arg3[%c0_9, %c0_10] : memref<64x32xbf16, #tpu.memory_space<vmem>>, vector<64x32xbf16>
    %cst_11 = arith.constant dense<0.000000e+00> : vector<2x32xf32>
    %31 = tpu.matmul %29, %30, %cst_11 {dimension_numbers = #tpu.dot_dimension_numbers<[1], [0], [0], [1], [0, 0, 1, 1], [], []>} : vector<2x64xbf16>, vector<64x32xbf16>, vector<2x32xf32> -> vector<2x32xf32>
    %c0_12 = arith.constant 0 : index
    %c0_13 = arith.constant 0 : index
    %32 = vector.load %arg4[%c0_12, %c0_13] : memref<2x32xf32, #tpu.memory_space<vmem>>, vector<2x32xf32>
    tpu.vector_store %arg4[%c0_12, %c0_13], %31 {strides = array<i32>} : memref<2x32xf32, #tpu.memory_space<vmem>>, vector<2x32xf32>,
    return
  }
}

</mosaic_0001>

<bundles_post_ra>
// kernel: text_encoder_forward.5
= control target key start
LH: loop header
LB: loop body
LE: loop exit
PB: predicated region body
PF: predicated region fallthrough
CT: control target
= control target key end

     0   :  { %vm22_vm0 = vcmask 517120   ;;  %s251_s0 = inlined_call_operand.vmem [shape: f32[2,64], index: 0, kind: input, shape index: {}]   ;;  %s252_s1 = inlined_call_operand.vmem [shape: f32[1,64], index: 1, kind: input, shape index: {}]   ;;  %s253_s2 = inlined_call_operand.vmem [shape: f32[1,64], index: 2, kind: input, shape index: {}]   ;;  %s254_s3 = inlined_call_operand.vmem [shape: bf16[64,32], index: 3, kind: input, shape index: {}]   ;;  %s255_s4 = inlined_call_operand.hbm [shape: f32[2,32], index: 4, kind: output, shape index: {}]  }
   0x1   :  { %v19_v0 = vld [vmem:[%s251_s0] sm:$0x3] }
   0x2   :  { %v23_v1 = vsel %vm22_vm0, %v19_v0, 0.0 }
   0x3   :  { %24 = vadd.xlane.f32.xlu0 %v23_v1 }
   0x4   :  { %9 = vsyncpa [#allocation3], 0  ;;  %v171_v7 = vld [vmem:[%s254_s3 + $0x18] sm:$0xff]   ;;  %v199_v8 = vmov 0.0   ;;  %vm200_vm1 = vmmov 0   ;;  %v172_v9 = vld [vmem:[%s254_s3 + $0x10] sm:$0xff]  }
   0x5   :  { %156 = vmatprep.subr.bf16.mxu0 %v199_v8  ;;  %164 = vmatprep.mubr.msk.bf16.mxu0 %vm200_vm1, %v199_v8  ;;  %v173_v10 = vld [vmem:[%s254_s3 + $0x8] sm:$0xff]   ;;  %v174_v11 = vld [vmem:[%s254_s3] sm:$0xff]   ;;  %vm84_vm2 = vcmask 523264   ;;  %s201_s3 = smov [#allocation2]   ;;  %vm128_vm3 = vcmask 254976  }
   0x6   :  { %157 = vmatpush3.bf16.msra.mxu0 %v171_v7  ;;  %v144_v16 = vld [vmem:[%s252_s1] ss:$0 sm:$0xff]  ;;  %s136_s28 = sshll.u32 %s201_s3, 4  ;;  %s137_s28 = int_to_ptr.vmem [resolvable:$true] %s136_s28 }
   0x7   :  { %158 = vmatprep.subr.bf16.mxu0 %v199_v8  ;;  %v145_v18 = vld [vmem:[%s253_s2] ss:$0 sm:$0xff]  ;;  %s177_s29 = scalar_lea.vmem %s137_s28, 32  ;;  %p182_p1 = scmp.lt.s32.totalorder %s137_s28, %s137_s28 }
   0x8   :  { %p178_p0 = scmp.ne.s32.totalorder %s137_s28, %s177_s29  ;;  %p183_p2 = scmp.lt.s32.totalorder %s177_s29, %s177_s29 }
   0xa   :  { %159 = vmatpush3.bf16.msra.mxu0 %v172_v9  ;;  %p184_p3 = por %p183_p2, %p182_p1 }
   0xb   :  { %160 = vmatprep.subr.bf16.mxu0 %v199_v8 }
   0xc   :  { %p185_p4 = pnand %p184_p3, %p178_p0 }
   0xe   :  { %161 = vmatpush3.bf16.msra.mxu0 %v173_v10 }
   0xf   :  { %162 = vmatprep.subr.bf16.mxu0 %v199_v8 }
  0x12   :  { %163 = vmatpush3.bf16.msra.mxu0 %v174_v11 }
  0x8c   :  { %v25_v2 = vpop.xlane.xlu0 %24 }
  0x8d   :  { %v27_v3 = vmul.f32 0.015625, %v25_v2 }
  0x8f   :  { %v28_v4 = vsub.f32 %v19_v0, %v27_v3 }
  0x91   :  { %v29_v5 = vmul.f32 %v28_v4, %v28_v4 }
  0x93   :  { %v30_v6 = vsel %vm22_vm0, %v29_v5, 0.0 }
  0x94   :  { %31 = vadd.xlane.f32.xlu0 %v30_v6 }
 0x11d   :  { %v32_v12 = vpop.xlane.xlu0 %31 }
 0x11e   :  { %v33_v13 = vmul.f32 0.015625, %v32_v12 }
 0x120   :  { %v34_v14 = vadd.f32 1e-05, %v33_v13 }
 0x122   :  { %175 = vrsqrt.f32 %v34_v14 }
 0x12f   :  { %v176_v15 = vpop.eup %175 }
 0x130   :  { %v36_v17 = vmul.f32 %v176_v15, %v28_v4 }
 0x132   :  { %v43_v19 = vmul.f32 %v144_v16, %v36_v17 }
 0x134   :  { %v50_v20 = vadd.f32 %v145_v18, %v43_v19 }
 0x136   :  { %v51_v21 = vpack.c.bf16 %v50_v20, %v50_v20 }
 0x138   :  { %165 = vmatmul.mubr.msk.bf16.vlgmr.msra.gmra.mxu0 %vm84_vm2, %v51_v21 }
 0x1f8   :  { %v122_v22 = vpop.f32.mrf.mxu0 }
 0x1f9   :  { %129 = vst.msk [vmem:[#allocation2] sm:$0x3] %vm128_vm3, %v122_v22 }
 0x1fa   :  { %v166_v23 = vpop.f32.mrf.mxu0 }
 0x1fb   :  { %188 = shalt.err (!%p185_p4)
}
 0x1fc   :  { %139 = dma.vmem_to_hbm [thread:$0]  %s137_s28, 32, %s255_s4, [#allocation3]   ;;  %v125_v24 = vpop.f32.mrf.mxu0 }
 0x1fe   :  { %v167_v25 = vpop.f32.mrf.mxu0 }
 0x1ff   :  { %197 = dma.done.wait [#allocation3], 32  }
 0x200   :  { %198 = vsyncadd [#allocation3], 4294967264 }
 0x201   :  { %143 = vsyncpa [#allocation3], 1 }

// kernel: text_encoder_forward.3
= control target key start
LH: loop header
LB: loop body
LE: loop exit
PB: predicated region body
PF: predicated region fallthrough
CT: control target
= control target key end

     0   :  { %vm49_vm0 = vcmask 523264   ;;  %v3148_v15 = vmov 0   ;;  %v3149_v40 = vmov 0.0   ;;  %v104_v41 = vlaneseq  ;;  %s3152_s15 = smov 112   ;;  %s3153_s16 = smov 96   ;;  %s3975_s0 = inlined_call_operand.vmem [shape: f32[2,8,64], index: 0, kind: input, shape index: {}]   ;;  %s3976_s3 = inlined_call_operand.vmem [shape: bf16[64,192], index: 3, kind: input, shape index: {}]   ;;  %s3977_s1 = inlined_call_operand.vmem [shape: f32[1,64], index: 1, kind: input, shape index: {}]   ;;  %s3978_s2 = inlined_call_operand.vmem [shape: f32[1,64], index: 2, kind: input, shape index: {}]   ;;  %s3979_s4 = inlined_call_operand.vmem [shape: f32[1,192], index: 4, kind: input, shape index: {}]   ;;  %s3980_s5 = inlined_call_operand.vmem [shape: bf16[64,64], index: 5, kind: input, shape index: {}]   ;;  %s3981_s6 = inlined_call_operand.vmem [shape: f32[1,64], index: 6, kind: input, shape index: {}]   ;;  %s3982_s9 = inlined_call_operand.vmem [shape: bf16[64,256], index: 9, kind: input, shape index: {}]   ;;  %s3983_s7 = inlined_call_operand.vmem [shape: f32[1,64], index: 7, kind: input, shape index: {}]   ;;  %s3984_s8 = inlined_call_operand.vmem [shape: f32[1,64], index: 8, kind: input, shape index: {}]   ;;  %s3985_s11 = inlined_call_operand.vmem [shape: bf16[256,64], index: 11, kind: input, shape index: {}]   ;;  %s3986_s10 = inlined_call_operand.vmem [shape: f32[1,256], index: 10, kind: input, shape index: {}]   ;;  %s3987_s12 = inlined_call_operand.vmem [shape: f32[1,64], index: 12, kind: input, shape index: {}]   ;;  %s3988_s13 = inlined_call_operand.vmem [shape: f32[2,8,64], index: 13, kind: output, shape index: {}]  }
   0x1   :  { %v45_v0 = vld [vmem:[%s3975_s0] sm:$0xff]  ;;  %v46_v1 = vld [vmem:[%s3975_s0 + $0x8] sm:$0xff]  ;;  %v3014_v14 = vld [vmem:[%s3976_s3 + $0x34] ss:$8 sps:$4 sm:$0xff]   ;;  %189 = vmatprep.mubr.bf16.mxu1 %v3148_v15  ;;  %2769 = vmatprep.subr.bf16.mxu0 %v3149_v40  ;;  %s3154_s17 = smov 88   ;;  %vm3155_vm1 = vmmov 0  }
   0x2   :  { %v50_v2 = vsel %vm49_vm0, %v45_v0, 0.0  ;;  %v53_v3 = vsel %vm49_vm0, %v46_v1, 0.0  ;;  %v3016_v16 = vld [vmem:[%s3976_s3 + $0x30] ss:$8 sps:$4 sm:$0xff]   ;;  %165 = vmatprep.subr.bf16.mxu1 %v3014_v14  ;;  %v3017_v17 = vld [vmem:[%s3976_s3 + $0x24] ss:$8 sps:$4 sm:$0xff]   ;;  %2771 = vmatprep.mubr.msk.bf16.mxu0 %vm3155_vm1, %v3149_v40 }
   0x3   :  { %51 = vadd.xlane.f32.xlu0 %v50_v2  ;;  %166 = vmatpush1.bf16.msra.mxu1 %v3016_v16  ;;  %v3019_v18 = vld [vmem:[%s3976_s3 + $0x20] ss:$8 sps:$4 sm:$0xff]   ;;  %v3020_v19 = vld [vmem:[%s3976_s3 + $0x14] ss:$8 sps:$4 sm:$0xff]   ;;  %v3022_v20 = vld [vmem:[%s3976_s3 + $0x10] ss:$8 sps:$4 sm:$0xff]  }
   0x4   :  { %167 = vmatprep.subr.bf16.mxu1 %v3017_v17  ;;  %v3023_v21 = vld [vmem:[%s3976_s3 + $0x4] ss:$8 sps:$4 sm:$0xff]   ;;  %v3025_v22 = vld [vmem:[%s3976_s3] ss:$8 sps:$4 sm:$0xff]   ;;  %v3281_v42 = vshrl.u32 %v104_v41, 7  ;;  %s3156_s18 = smov 80  }
   0x5   :  { %v2563_v31 = vld [vmem:[%s3977_s1] ss:$0 sm:$0xff]  ;;  %s3157_s19 = smov 64   ;;  %s3158_s20 = smov 72   ;;  %vm276_vm2 = vcmask 64512   ;;  %vm1298_vm3 = vcmask 1043456  }
   0x6   :  { %v2564_v35 = vld [vmem:[%s3978_s2] ss:$0 sm:$0xff]  ;;  %v106_v43 = vsub.s32 0, %v3281_v42  ;;  %s3150_s2 = smov 120   ;;  %s3159_s21 = smov 8   ;;  %vm2090_vm5 = vcmask 130048  }
   0x7   :  { %54 = vadd.xlane.f32.xlu0 %v53_v3  ;;  %168 = vmatpush1.bf16.msra.mxu1 %v3019_v18  ;;  %v3287_v44 = vld [vmem:[%s3979_s4] sm:$0x3]  ;;  %s3151_s4 = smov 104   ;;  %s3160_s22 = smov 16   ;;  %vm2093_vm6 = vcmask 195584   ;;  %vm2096_vm7 = vcmask 261120  }
   0x8   :  { %169 = vmatprep.subr.bf16.mxu1 %v3020_v19  ;;  %v107_v45 = vrot.slane %v3287_v44, %v106_v43  ;;  %s3161_s23 = smov 24   ;;  %s3162_s24 = smov 32   ;;  %vm2099_vm8 = vcmask 326656   ;;  %vm2102_vm9 = vcmask 392192   ;;  %vm2105_vm10 = vcmask 457728  }
   0x9   :  { %s3163_s25 = smov 40   ;;  %s3164_s1 = smov 48  }
   0xb   :  { %170 = vmatpush1.bf16.msra.mxu1 %v3022_v20 }
   0xc   :  { %171 = vmatprep.subr.bf16.mxu1 %v3023_v21 }
   0xf   :  { %172 = vmatpush1.bf16.msra.mxu1 %v3025_v22 }
  0x10   :  { %2757 = vmatprep.subr.bf16.mxu1 %v3149_v40 }
  0x8c   :  { %v52_v4 = vpop.xlane.xlu0 %51 }
  0x8d   :  { %v57_v5 = vmul.f32 0.015625, %v52_v4 }
  0x8f   :  { %v59_v6 = vsub.f32 %v45_v0, %v57_v5 }
  0x90   :  { %v55_v7 = vpop.xlane.xlu0 %54 }
  0x91   :  { %v58_v8 = vmul.f32 0.015625, %v55_v7  ;;  %v61_v9 = vmul.f32 %v59_v6, %v59_v6 }
  0x93   :  { %v60_v10 = vsub.f32 %v46_v1, %v58_v8  ;;  %v63_v11 = vsel %vm49_vm0, %v61_v9, 0.0 }
  0x94   :  { %64 = vadd.xlane.f32.xlu1 %v63_v11  ;;  %v110_v11 = vsub.s32 1, %v3281_v42 }
  0x95   :  { %v62_v12 = vmul.f32 %v60_v10, %v60_v10 }
  0x96   :  { %v111_v16 = vrot.slane %v3287_v44, %v110_v11 }
  0x97   :  { %v66_v13 = vsel %vm49_vm0, %v62_v12, 0.0 }
  0x98   :  { %67 = vadd.xlane.f32.xlu1 %v66_v13 }
 0x11d   :  { %v65_v23 = vpop.xlane.xlu1 %64 }
 0x11e   :  { %v69_v24 = vmul.f32 0.015625, %v65_v23 }
 0x120   :  { %v71_v25 = vadd.f32 1e-05, %v69_v24 }
 0x121   :  { %v68_v26 = vpop.xlane.xlu1 %67 }
 0x122   :  { %3058 = vrsqrt.f32 %v71_v25  ;;  %v70_v27 = vmul.f32 0.015625, %v68_v26 }
 0x124   :  { %v72_v28 = vadd.f32 1e-05, %v70_v27 }
 0x126   :  { %3060 = vrsqrt.f32 %v72_v28 }
 0x12f   :  { %v3059_v29 = vpop.eup %3058 }
 0x130   :  { %v75_v30 = vmul.f32 %v3059_v29, %v59_v6 }
 0x132   :  { %v83_v34 = vmul.f32 %v2563_v31, %v75_v30 }
 0x133   :  { %v3061_v32 = vpop.eup %3060 }
 0x134   :  { %v76_v33 = vmul.f32 %v3061_v32, %v60_v10  ;;  %v91_v37 = vadd.f32 %v2564_v35, %v83_v34 }
 0x136   :  { %v84_v36 = vmul.f32 %v2563_v31, %v76_v33 }
 0x138   :  { %v92_v38 = vadd.f32 %v2564_v35, %v84_v36 }
 0x13a   :  { %v93_v39 = vpack.c.bf16 %v92_v38, %v91_v37 }
 0x13c   :  { %2573 = vmatmul.mubr.msk.bf16.vlgmr.msra.gmra.mxu1 %vm49_vm0, %v93_v39 }
 0x13d   :  { %2759 = vmatprep.mubr.msk.bf16.mxu1 %vm3155_vm1, %v3149_v40 }
 0x1fc   :  { %v191_v46 = vpop.f32.mrf.mxu1 }
 0x1fd   :  { %v192_v47 = vadd.f32 %v191_v46, %v107_v45 }
 0x1fe   :  { %v3292_v48 = vpop.f32.mrf.mxu1 }
 0x1ff   :  { %v3294_v49 = vpack.c.bf16 %v192_v47, %v192_v47  ;;  %v194_v21 = vadd.f32 %v3292_v48, %v111_v16 }
 0x200   :  { %v195_v50 = vpop.f32.mrf.mxu1 }
 0x201   :  { %v196_v51 = vadd.f32 %v195_v50, %v107_v45  ;;  %207 = vrot.lane.b32.xlu0 %v3294_v49, %s3150_s2  ;;  %v3415_v26 = vpack.c.bf16 %v194_v21, %v194_v21 }
 0x202   :  { %v197_v18 = vpop.f32.mrf.mxu1 }
 0x203   :  { %v3298_v52 = vpack.c.bf16 %v196_v51, %v196_v51  ;;  %v198_v22 = vadd.f32 %v197_v18, %v111_v16 }
 0x205   :  { %209 = vrot.lane.b32.xlu1 %v3298_v52, %s3150_s2  ;;  %215 = vrot.lane.b32.xlu0 %v3294_v49, %s3151_s4  ;;  %v3417_v27 = vpack.c.bf16 %v198_v22, %v198_v22 }
 0x209   :  { %211 = vrot.lane.b32.xlu1 %v3294_v49, %s3152_s15  ;;  %219 = vrot.lane.b32.xlu0 %v3294_v49, %s3153_s16 }
 0x20d   :  { %213 = vrot.lane.b32.xlu1 %v3298_v52, %s3152_s15  ;;  %223 = vrot.lane.b32.xlu0 %v3294_v49, %s3154_s17 }
 0x211   :  { %217 = vrot.lane.b32.xlu1 %v3298_v52, %s3151_s4  ;;  %227 = vrot.lane.b32.xlu0 %v3294_v49, %s3156_s18 }
 0x215   :  { %221 = vrot.lane.b32.xlu1 %v3298_v52, %s3153_s16  ;;  %274 = vrot.lane.b32.xlu0 %v3294_v49, %s3157_s19 }
 0x219   :  { %225 = vrot.lane.b32.xlu1 %v3298_v52, %s3154_s17  ;;  %233 = vrot.lane.b32.xlu0 %v3298_v52, %s3158_s20 }
 0x21d   :  { %229 = vrot.lane.b32.xlu1 %v3298_v52, %s3156_s18 }
 0x221   :  { %231 = vrot.lane.b32.xlu1 %v3294_v49, %s3158_s20 }
 0x225   :  { %323 = vrot.lane.b32.xlu1 %v3298_v52, %s3157_s19 }
 0x273   :  { %v3334_v53 = vpop.permute.xlu0 %207 }
 0x274   :  { %v2580_v54 = vcombine.low %v3334_v53, %v3334_v53 }
 0x276   :  { %373 = vrot.lane.b32.xlu0 %v2580_v54, %s3157_s19 }
 0x277   :  { %v3339_v55 = vpop.permute.xlu1 %209  ;;  %v3341_v56 = vpop.permute.xlu0 %215 }
 0x278   :  { %v2582_v57 = vcombine.low %v3339_v55, %v3339_v55  ;;  %v2588_v63 = vcombine.low %v3341_v56, %v3341_v56 }
 0x27a   :  { %423 = vrot.lane.b32.xlu1 %v2582_v57, %s3157_s19 }
 0x27b   :  { %v3346_v58 = vpop.permute.xlu1 %211  ;;  %v3348_v59 = vpop.permute.xlu0 %219 }
 0x27c   :  { %v2584_v60 = vcombine.low %v3346_v58, %v3346_v58  ;;  %v2592_v3 = vcombine.low %v3348_v59, %v3348_v59 }
 0x27e   :  { %473 = vrot.lane.b32.xlu0 %v2584_v60, %s3157_s19 }
 0x27f   :  { %v3353_v61 = vpop.permute.xlu1 %213  ;;  %v3355_v62 = vpop.permute.xlu0 %223 }
 0x280   :  { %v2586_v0 = vcombine.low %v3353_v61, %v3353_v61  ;;  %v2596_v7 = vcombine.low %v3355_v62, %v3355_v62 }
 0x282   :  { %523 = vrot.lane.b32.xlu1 %v2586_v0, %s3157_s19  ;;  %573 = vrot.lane.b32.xlu0 %v2588_v63, %s3157_s19  ;;  %v271_v63 = vand.u32 127, %v104_v41 }
 0x283   :  { %v3363_v1 = vpop.permute.xlu1 %217  ;;  %v3365_v2 = vpop.permute.xlu0 %227 }
 0x284   :  { %v2590_v4 = vcombine.low %v3363_v1, %v3363_v1  ;;  %v2600_v12 = vcombine.low %v3365_v2, %v3365_v2  ;;  %vm272_vm4 = vcmp.gt.s32.totalorder %v271_v63, %v3281_v42 }
 0x285   :  { %v3530_v0 = vsel %vm272_vm4, -1e+09, %v3149_v40 }
 0x286   :  { %623 = vrot.lane.b32.xlu1 %v2590_v4, %s3157_s19  ;;  %673 = vrot.lane.b32.xlu0 %v2592_v3, %s3157_s19 }
 0x287   :  { %v3373_v5 = vpop.permute.xlu1 %221  ;;  %v275_v6 = vpop.permute.xlu0 %274 }
 0x288   :  { %v2594_v8 = vcombine.low %v3373_v5, %v3373_v5  ;;  %v281_v9 = vsel %vm276_vm2, %v275_v6, 0 }
 0x289   :  { %2758 = vmatpush3.bf16.xpose.msra.mxu1 %v281_v9 }
 0x28a   :  { %723 = vrot.lane.b32.xlu1 %v2594_v8, %s3157_s19  ;;  %773 = vrot.lane.b32.xlu0 %v2596_v7, %s3157_s19 }
 0x28b   :  { %v3382_v10 = vpop.permute.xlu1 %225  ;;  %2763 = vmatprep.subr.bf16.mxu1 %v3149_v40  ;;  %v3401_v19 = vpop.permute.xlu0 %233 }
 0x28c   :  { %v2598_v13 = vcombine.low %v3382_v10, %v3382_v10  ;;  %v2606_v23 = vcombine.low %v3401_v19, %v3401_v19 }
 0x28e   :  { %823 = vrot.lane.b32.xlu1 %v2598_v13, %s3157_s19  ;;  %873 = vrot.lane.b32.xlu0 %v2600_v12, %s3157_s19 }
 0x28f   :  { %v3392_v14 = vpop.permute.xlu1 %229 }
 0x290   :  { %v2602_v17 = vcombine.low %v3392_v14, %v3392_v14  ;;  %2760 = vmatmul.mubr.msk.bf16.vlgmr.msra.gmra.mxu1 %vm276_vm2, %v3294_v49 }
 0x291   :  { %2765 = vmatprep.mubr.msk.bf16.mxu1 %vm3155_vm1, %v3149_v40 }
 0x292   :  { %923 = vrot.lane.b32.xlu1 %v2602_v17, %s3157_s19 }
 0x293   :  { %v3406_v20 = vpop.permute.xlu1 %231 }
 0x294   :  { %v2604_v24 = vcombine.low %v3406_v20, %v3406_v20 }
 0x296   :  { %973 = vrot.lane.b32.xlu0 %v2604_v24, %s3157_s19  ;;  %1023 = vrot.lane.b32.xlu1 %v2606_v23, %s3157_s19 }
 0x297   :  { %v324_v25 = vpop.permute.xlu1 %323 }
 0x298   :  { %v329_v28 = vsel %vm276_vm2, %v324_v25, 0 }
 0x299   :  { %2764 = vmatpush3.bf16.xpose.msra.mxu1 %v329_v28 }
 0x29a   :  { %240 = vrot.lane.b32.xlu0 %v3415_v26, %s3150_s2  ;;  %242 = vrot.lane.b32.xlu1 %v3417_v27, %s3150_s2 }
 0x29b   :  { %2775 = vmatprep.subr.bf16.mxu1 %v3149_v40 }
 0x29e   :  { %244 = vrot.lane.b32.xlu0 %v3415_v26, %s3152_s15  ;;  %246 = vrot.lane.b32.xlu1 %v3417_v27, %s3152_s15 }
 0x2a0   :  { %2766 = vmatmul.mubr.msk.bf16.vlgmr.msra.gmra.mxu1 %vm276_vm2, %v3298_v52 }
 0x2a1   :  { %2777 = vmatprep.mubr.msk.bf16.mxu1 %vm3155_vm1, %v3149_v40 }
 0x2a2   :  { %248 = vrot.lane.b32.xlu0 %v3415_v26, %s3151_s4  ;;  %250 = vrot.lane.b32.xlu1 %v3417_v27, %s3151_s4  ;;  %s3165_s4 = smov 56  }
 0x2e8   :  { %v374_v29 = vpop.permute.xlu0 %373 }
 0x2e9   :  { %v379_v30 = vsel %vm276_vm2, %v374_v29, 0 }
 0x2ea   :  { %2770 = vmatpush3.bf16.xpose.msra.mxu0 %v379_v30 }
 0x2eb   :  { %2781 = vmatprep.subr.bf16.mxu0 %v3149_v40 }
 0x2ec   :  { %v424_v31 = vpop.permute.xlu1 %423 }
 0x2ed   :  { %v429_v32 = vsel %vm276_vm2, %v424_v31, 0 }
 0x2ee   :  { %2776 = vmatpush3.bf16.xpose.msra.mxu1 %v429_v32 }
 0x2ef   :  { %2787 = vmatprep.subr.bf16.mxu1 %v3149_v40 }
 0x2f0   :  { %v474_v33 = vpop.permute.xlu0 %473 }
 0x2f1   :  { %v479_v34 = vsel %vm276_vm2, %v474_v33, 0  ;;  %2772 = vmatmul.mubr.msk.bf16.vlgmr.msra.gmra.mxu0 %vm276_vm2, %v3334_v53 }
 0x2f2   :  { %2782 = vmatpush3.bf16.xpose.msra.mxu0 %v479_v34  ;;  %2783 = vmatprep.mubr.msk.bf16.mxu0 %vm3155_vm1, %v3149_v40 }
 0x2f3   :  { %2793 = vmatprep.subr.bf16.mxu0 %v3149_v40 }
 0x2f4   :  { %v524_v35 = vpop.permute.xlu1 %523  ;;  %v574_v37 = vpop.permute.xlu0 %573 }
 0x2f5   :  { %v529_v36 = vsel %vm276_vm2, %v524_v35, 0  ;;  %2778 = vmatmul.mubr.msk.bf16.vlgmr.msra.gmra.mxu1 %vm276_vm2, %v3339_v55  ;;  %v579_v38 = vsel %vm276_vm2, %v574_v37, 0 }
 0x2f6   :  { %2788 = vmatpush3.bf16.xpose.msra.mxu1 %v529_v36  ;;  %2789 = vmatprep.mubr.msk.bf16.mxu1 %vm3155_vm1, %v3149_v40 }
 0x2f7   :  { %2799 = vmatprep.subr.bf16.mxu1 %v3149_v40 }
 0x2f8   :  { %v624_v39 = vpop.permute.xlu1 %623  ;;  %v674_v45 = vpop.permute.xlu0 %673 }
 0x2f9   :  { %2784 = vmatmul.mubr.msk.bf16.vlgmr.msra.gmra.mxu0 %vm276_vm2, %v3346_v58  ;;  %v629_v44 = vsel %vm276_vm2, %v624_v39, 0  ;;  %v679_v46 = vsel %vm276_vm2, %v674_v45, 0 }
 0x2fa   :  { %2794 = vmatpush3.bf16.xpose.msra.mxu0 %v579_v38  ;;  %2795 = vmatprep.mubr.msk.bf16.mxu0 %vm3155_vm1, %v3149_v40 }
 0x2fb   :  { %2805 = vmatprep.subr.bf16.mxu0 %v3149_v40 }
 0x2fc   :  { %v724_v47 = vpop.permute.xlu1 %723  ;;  %v774_v49 = vpop.permute.xlu0 %773 }
 0x2fd   :  { %2790 = vmatmul.mubr.msk.bf16.vlgmr.msra.gmra.mxu1 %vm276_vm2, %v3353_v61  ;;  %v729_v48 = vsel %vm276_vm2, %v724_v47, 0  ;;  %v779_v50 = vsel %vm276_vm2, %v774_v49, 0  ;;  %v1300_v61 = vsel %vm1298_vm3, %v3415_v26, 0 }
 0x2fe   :  { %2800 = vmatpush3.bf16.xpose.msra.mxu1 %v629_v44  ;;  %2801 = vmatprep.mubr.msk.bf16.mxu1 %vm3155_vm1, %v3149_v40 }
 0x2ff   :  { %2811 = vmatprep.subr.bf16.mxu1 %v3149_v40 }
 0x300   :  { %v824_v51 = vpop.permute.xlu1 %823  ;;  %v874_v53 = vpop.permute.xlu0 %873 }
 0x301   :  { %2796 = vmatmul.mubr.msk.bf16.vlgmr.msra.gmra.mxu0 %vm276_vm2, %v3341_v56  ;;  %v829_v52 = vsel %vm276_vm2, %v824_v51, 0  ;;  %v879_v54 = vsel %vm276_vm2, %v874_v53, 0 }
 0x302   :  { %2806 = vmatpush3.bf16.xpose.msra.mxu0 %v679_v46  ;;  %2807 = vmatprep.mubr.msk.bf16.mxu0 %vm3155_vm1, %v3149_v40 }
 0x303   :  { %2817 = vmatprep.subr.bf16.mxu0 %v3149_v40 }
 0x304   :  { %v924_v55 = vpop.permute.xlu1 %923 }
 0x305   :  { %2802 = vmatmul.mubr.msk.bf16.vlgmr.msra.gmra.mxu1 %vm276_vm2, %v3363_v1  ;;  %v929_v56 = vsel %vm276_vm2, %v924_v55, 0 }
 0x306   :  { %2812 = vmatpush3.bf16.xpose.msra.mxu1 %v729_v48  ;;  %2813 = vmatprep.mubr.msk.bf16.mxu1 %vm3155_vm1, %v3149_v40 }
 0x307   :  { %2823 = vmatprep.subr.bf16.mxu1 %v3149_v40 }
 0x308   :  { %v974_v57 = vpop.permute.xlu0 %973 }
 0x309   :  { %2808 = vmatmul.mubr.msk.bf16.vlgmr.msra.gmra.mxu0 %vm276_vm2, %v3348_v59  ;;  %v979_v58 = vsel %vm276_vm2, %v974_v57, 0  ;;  %v1024_v59 = vpop.permute.xlu1 %1023 }
 0x30a   :  { %2818 = vmatpush3.bf16.xpose.msra.mxu0 %v779_v50  ;;  %2819 = vmatprep.mubr.msk.bf16.mxu0 %vm3155_vm1, %v3149_v40  ;;  %v1029_v60 = vsel %vm276_vm2, %v1024_v59, 0 }
 0x30b   :  { %2829 = vmatprep.subr.bf16.mxu0 %v3149_v40 }
 0x30d   :  { %2814 = vmatmul.mubr.msk.bf16.vlgmr.msra.gmra.mxu1 %vm276_vm2, %v3373_v5 }
 0x30e   :  { %2824 = vmatpush3.bf16.xpose.msra.mxu1 %v829_v52  ;;  %2825 = vmatprep.mubr.msk.bf16.mxu1 %vm3155_vm1, %v3149_v40 }
 0x30f   :  { %2835 = vmatprep.subr.bf16.mxu1 %v3149_v40 }
 0x311   :  { %2820 = vmatmul.mubr.msk.bf16.vlgmr.msra.gmra.mxu0 %vm276_vm2, %v3355_v62  ;;  %v1346_v62 = vsel %vm1298_vm3, %v3417_v27, 0 }
 0x312   :  { %2830 = vmatpush3.bf16.xpose.msra.mxu0 %v879_v54  ;;  %2831 = vmatprep.mubr.msk.bf16.mxu0 %vm3155_vm1, %v3149_v40 }
 0x313   :  { %2841 = vmatprep.subr.bf16.mxu0 %v3149_v40 }
 0x315   :  { %2826 = vmatmul.mubr.msk.bf16.vlgmr.msra.gmra.mxu1 %vm276_vm2, %v3382_v10 }
 0x316   :  { %2836 = vmatpush3.bf16.xpose.msra.mxu1 %v929_v56  ;;  %2837 = vmatprep.mubr.msk.bf16.mxu1 %vm3155_vm1, %v3149_v40 }
 0x317   :  { %2847 = vmatprep.subr.bf16.mxu1 %v3149_v40 }
 0x319   :  { %2832 = vmatmul.mubr.msk.bf16.vlgmr.msra.gmra.mxu0 %vm276_vm2, %v3365_v2 }
 0x31a   :  { %2842 = vmatpush3.bf16.xpose.msra.mxu0 %v979_v58  ;;  %2843 = vmatprep.mubr.msk.bf16.mxu0 %vm3155_vm1, %v3149_v40 }
 0x31b   :  { %2853 = vmatprep.subr.bf16.mxu0 %v3149_v40 }
 0x31d   :  { %2838 = vmatmul.mubr.msk.bf16.vlgmr.msra.gmra.mxu1 %vm276_vm2, %v3392_v14 }
 0x31e   :  { %2848 = vmatpush3.bf16.xpose.msra.mxu1 %v1029_v60  ;;  %2849 = vmatprep.mubr.msk.bf16.mxu1 %vm3155_vm1, %v3149_v40 }
 0x31f   :  { %2859 = vmatprep.subr.bf16.mxu1 %v3149_v40 }
 0x321   :  { %2844 = vmatmul.mubr.msk.bf16.vlgmr.msra.gmra.mxu0 %vm276_vm2, %v3406_v20 }
 0x322   :  { %2854 = vmatpush3.bf16.msra.mxu0 %v1300_v61  ;;  %2855 = vmatprep.mubr.msk.bf16.mxu0 %vm3155_vm1, %v3149_v40 }
 0x323   :  { %2865 = vmatprep.subr.bf16.mxu0 %v3149_v40 }
 0x325   :  { %2850 = vmatmul.mubr.msk.bf16.vlgmr.msra.gmra.mxu1 %vm276_vm2, %v3401_v19 }
 0x326   :  { %2860 = vmatpush3.bf16.msra.mxu1 %v1346_v62  ;;  %2861 = vmatprep.mubr.msk.bf16.mxu1 %vm3155_vm1, %v3149_v40 }
 0x327   :  { %2871 = vmatprep.subr.bf16.mxu1 %v3149_v40 }
 0x350   :  { %v317_v1 = vpop.f32.mrf.mxu1 }
 0x351   :  { %v1071_v2 = vmul.f32 0.35355338, %v317_v1 }
 0x352   :  { %v2761_v3 = vpop.f32.mrf.mxu1 }
 0x353   :  { %v3533_v4 = vadd.f32 %v1071_v2, %v3530_v0 }
 0x354   :  { %v320_v5 = vpop.f32.mrf.mxu1 }
 0x355   :  { %v1103_v6 = vsel %vm276_vm2, %v3533_v4, -inf }
 0x356   :  { %1104 = vmax.xlane.f32.xlu0 %v1103_v6  ;;  %v2762_v7 = vpop.f32.mrf.mxu1 }
 0x360   :  { %v365_v8 = vpop.f32.mrf.mxu1 }
 0x361   :  { %v1072_v9 = vmul.f32 0.35355338, %v365_v8 }
 0x362   :  { %v2767_v41 = vpop.f32.mrf.mxu1 }
 0x363   :  { %v3538_v10 = vadd.f32 %v1072_v9, %v3530_v0 }
 0x364   :  { %v368_v12 = vpop.f32.mrf.mxu1 }
 0x365   :  { %v1106_v13 = vsel %vm276_vm2, %v3538_v10, -inf }
 0x366   :  { %v2768_v14 = vpop.f32.mrf.mxu1  ;;  %1107 = vmax.xlane.f32.xlu1 %v1106_v13  ;;  %v3577_v13 = vpop.permute.xlu0 %240 }
 0x3b1   :  { %v415_v16 = vpop.f32.mrf.mxu0 }
 0x3b2   :  { %v1073_v17 = vmul.f32 0.35355338, %v415_v16 }
 0x3b3   :  { %v2773_v18 = vpop.f32.mrf.mxu0 }
 0x3b4   :  { %v3543_v19 = vadd.f32 %v1073_v17, %v3530_v0 }
 0x3b5   :  { %v418_v20 = vpop.f32.mrf.mxu0  ;;  %v465_v21 = vpop.f32.mrf.mxu1 }
 0x3b6   :  { %v1074_v22 = vmul.f32 0.35355338, %v465_v21  ;;  %v1109_v23 = vsel %vm276_vm2, %v3543_v19, -inf }
 0x3b7   :  { %v2779_v24 = vpop.f32.mrf.mxu1  ;;  %1110 = vmax.xlane.f32.xlu0 %v1109_v23  ;;  %v2774_v25 = vpop.f32.mrf.mxu0 }
 0x3b8   :  { %v3548_v28 = vadd.f32 %v1074_v22, %v3530_v0 }
 0x3b9   :  { %v468_v29 = vpop.f32.mrf.mxu1  ;;  %v515_v30 = vpop.f32.mrf.mxu0 }
 0x3ba   :  { %v1075_v31 = vmul.f32 0.35355338, %v515_v30  ;;  %v1112_v32 = vsel %vm276_vm2, %v3548_v28, -inf  ;;  %v3587_v29 = vpop.permute.xlu0 %244 }
 0x3bb   :  { %v2780_v33 = vpop.f32.mrf.mxu1  ;;  %1113 = vmax.xlane.f32.xlu0 %v1112_v32  ;;  %v2785_v34 = vpop.f32.mrf.mxu0 }
 0x3bc   :  { %v3553_v35 = vadd.f32 %v1075_v31, %v3530_v0 }
 0x3bd   :  { %v518_v36 = vpop.f32.mrf.mxu0  ;;  %v565_v37 = vpop.f32.mrf.mxu1 }
 0x3be   :  { %v1076_v38 = vmul.f32 0.35355338, %v565_v37  ;;  %v1115_v39 = vsel %vm276_vm2, %v3553_v35, -inf }
 0x3bf   :  { %v2791_v44 = vpop.f32.mrf.mxu1  ;;  %1116 = vmax.xlane.f32.xlu0 %v1115_v39  ;;  %v2786_v45 = vpop.f32.mrf.mxu0 }
 0x3c0   :  { %v3558_v46 = vadd.f32 %v1076_v38, %v3530_v0 }
 0x3c1   :  { %v568_v47 = vpop.f32.mrf.mxu1  ;;  %v615_v48 = vpop.f32.mrf.mxu0 }
 0x3c2   :  { %v1077_v49 = vmul.f32 0.35355338, %v615_v48  ;;  %v1118_v50 = vsel %vm276_vm2, %v3558_v46, -inf  ;;  %v3596_v47 = vpop.permute.xlu0 %248 }
 0x3c3   :  { %v2792_v51 = vpop.f32.mrf.mxu1  ;;  %1119 = vmax.xlane.f32.xlu1 %v1118_v50  ;;  %v2797_v52 = vpop.f32.mrf.mxu0 }
 0x3c4   :  { %v3563_v53 = vadd.f32 %v1077_v49, %v3530_v0 }
 0x3c5   :  { %v618_v54 = vpop.f32.mrf.mxu0  ;;  %v665_v55 = vpop.f32.mrf.mxu1 }
 0x3c6   :  { %v1078_v56 = vmul.f32 0.35355338, %v665_v55  ;;  %v1121_v57 = vsel %vm276_vm2, %v3563_v53, -inf }
 0x3c7   :  { %v2803_v58 = vpop.f32.mrf.mxu1  ;;  %1122 = vmax.xlane.f32.xlu0 %v1121_v57  ;;  %v2798_v59 = vpop.f32.mrf.mxu0 }
 0x3c8   :  { %v3568_v60 = vadd.f32 %v1078_v56, %v3530_v0 }
 0x3c9   :  { %v668_v61 = vpop.f32.mrf.mxu1  ;;  %v715_v62 = vpop.f32.mrf.mxu0 }
 0x3ca   :  { %v1079_v63 = vmul.f32 0.35355338, %v715_v62  ;;  %v1124_v1 = vsel %vm276_vm2, %v3568_v60, -inf }
 0x3cb   :  { %v2804_v2 = vpop.f32.mrf.mxu1  ;;  %1125 = vmax.xlane.f32.xlu1 %v1124_v1  ;;  %v2809_v3 = vpop.f32.mrf.mxu0 }
 0x3cc   :  { %v3573_v5 = vadd.f32 %v1079_v63, %v3530_v0 }
 0x3cd   :  { %v718_v6 = vpop.f32.mrf.mxu0  ;;  %v765_v7 = vpop.f32.mrf.mxu1 }
 0x3ce   :  { %v1080_v8 = vmul.f32 0.35355338, %v765_v7  ;;  %v1127_v9 = vsel %vm276_vm2, %v3573_v5, -inf }
 0x3cf   :  { %v2815_v41 = vpop.f32.mrf.mxu1  ;;  %1128 = vmax.xlane.f32.xlu0 %v1127_v9  ;;  %v2810_v12 = vpop.f32.mrf.mxu0 }
 0x3d0   :  { %v3580_v14 = vadd.f32 %v1080_v8, %v3530_v0 }
 0x3d1   :  { %v768_v16 = vpop.f32.mrf.mxu1  ;;  %v815_v17 = vpop.f32.mrf.mxu0 }
 0x3d2   :  { %v1081_v18 = vmul.f32 0.35355338, %v815_v17  ;;  %v1130_v20 = vsel %vm276_vm2, %v3580_v14, -inf  ;;  %v3609_v16 = vpop.permute.xlu1 %242 }
 0x3d3   :  { %v2816_v21 = vpop.f32.mrf.mxu1  ;;  %1131 = vmax.xlane.f32.xlu1 %v1130_v20  ;;  %v2821_v22 = vpop.f32.mrf.mxu0 }
 0x3d4   :  { %v3585_v23 = vadd.f32 %v1081_v18, %v3530_v0 }
 0x3d5   :  { %v818_v24 = vpop.f32.mrf.mxu0  ;;  %v865_v25 = vpop.f32.mrf.mxu1 }
 0x3d6   :  { %v1082_v30 = vmul.f32 0.35355338, %v865_v25  ;;  %v1133_v31 = vsel %vm276_vm2, %v3585_v23, -inf  ;;  %v3620_v20 = vpop.permute.xlu1 %246 }
 0x3d7   :  { %v2827_v32 = vpop.f32.mrf.mxu1  ;;  %1134 = vmax.xlane.f32.xlu0 %v1133_v31  ;;  %v2822_v33 = vpop.f32.mrf.mxu0 }
 0x3d8   :  { %v3592_v34 = vadd.f32 %v1082_v30, %v3530_v0 }
 0x3d9   :  { %v868_v36 = vpop.f32.mrf.mxu1  ;;  %v915_v37 = vpop.f32.mrf.mxu0 }
 0x3da   :  { %v1083_v38 = vmul.f32 0.35355338, %v915_v37  ;;  %v1136_v39 = vsel %vm276_vm2, %v3592_v34, -inf  ;;  %v3626_v22 = vpop.permute.xlu1 %250 }
 0x3db   :  { %v2828_v44 = vpop.f32.mrf.mxu1  ;;  %1137 = vmax.xlane.f32.xlu1 %v1136_v39  ;;  %v2833_v45 = vpop.f32.mrf.mxu0 }
 0x3dc   :  { %v3599_v48 = vadd.f32 %v1083_v38, %v3530_v0 }
 0x3dd   :  { %v918_v49 = vpop.f32.mrf.mxu0  ;;  %v965_v50 = vpop.f32.mrf.mxu1 }
 0x3de   :  { %v1084_v51 = vmul.f32 0.35355338, %v965_v50  ;;  %v1139_v52 = vsel %vm276_vm2, %v3599_v48, -inf }
 0x3df   :  { %v2839_v54 = vpop.f32.mrf.mxu1  ;;  %1140 = vmax.xlane.f32.xlu0 %v1139_v52  ;;  %v2834_v55 = vpop.f32.mrf.mxu0 }
 0x3e0   :  { %v1105_v56 = vpop.xlane.xlu0 %1104  ;;  %v3604_v57 = vadd.f32 %v1084_v51, %v3530_v0 }
 0x3e1   :  { %v1151_v58 = vsub.f32 %v3533_v4, %v1105_v56  ;;  %v968_v59 = vpop.f32.mrf.mxu1  ;;  %v1015_v61 = vpop.f32.mrf.mxu0 }
 0x3e2   :  { %v1142_v62 = vsel %vm276_vm2, %v3604_v57, -inf  ;;  %v1085_v12 = vmul.f32 0.35355338, %v1015_v61 }
 0x3e3   :  { %v1167_v63 = vmul.f32 1.442695, %v1151_v58  ;;  %v2840_v1 = vpop.f32.mrf.mxu1  ;;  %1143 = vmax.xlane.f32.xlu1 %v1142_v62  ;;  %v2845_v2 = vpop.f32.mrf.mxu0 }
 0x3e4   :  { %v3616_v18 = vadd.f32 %v1085_v12, %v3530_v0 }
 0x3e5   :  { %3062 = vpow2.f32 %v1167_v63  ;;  %v1018_v3 = vpop.f32.mrf.mxu0  ;;  %v1065_v6 = vpop.f32.mrf.mxu1 }
 0x3e6   :  { %v1145_v21 = vsel %vm276_vm2, %v3616_v18, -inf  ;;  %v1086_v31 = vmul.f32 0.35355338, %v1065_v6 }
 0x3e7   :  { %v2846_v7 = vpop.f32.mrf.mxu0  ;;  %v2851_v8 = vpop.f32.mrf.mxu1 }
 0x3e8   :  { %v3636_v36 = vadd.f32 %v1086_v31, %v3530_v0 }
 0x3e9   :  { %v1068_v9 = vpop.f32.mrf.mxu1 }
 0x3ea   :  { %v1148_v37 = vsel %vm276_vm2, %v3636_v36, -inf }
 0x3eb   :  { %v2852_v41 = vpop.f32.mrf.mxu1 }
 0x3ef   :  { %v1108_v24 = vpop.xlane.xlu1 %1107 }
 0x3f0   :  { %v1152_v25 = vsub.f32 %v3538_v10, %v1108_v24 }
 0x3f2   :  { %v3611_v4 = vpop.eup %3062  ;;  %v1169_v30 = vmul.f32 1.442695, %v1152_v25 }
 0x3f3   :  { %v1199_v17 = vsel %vm276_vm2, %v3611_v4, 0.0 }
 0x3f4   :  { %1200 = vadd.xlane.f32.xlu0 %v1199_v17  ;;  %254 = vrot.lane.b32.xlu1 %v3417_v27, %s3153_s16  ;;  %3064 = vpow2.f32 %v1169_v30 }
 0x3f8   :  { %1146 = vmax.xlane.f32.xlu0 %v1145_v21  ;;  %256 = vrot.lane.b32.xlu1 %v3415_v26, %s3154_s17 }
 0x401   :  { %v3631_v32 = vpop.eup %3064 }
 0x402   :  { %v1202_v33 = vsel %vm276_vm2, %v3631_v32, 0.0 }
 0x40e   :  { %252 = vrot.lane.b32.xlu0 %v3415_v26, %s3153_s16 }
 0x41c   :  { %1203 = vadd.xlane.f32.xlu1 %v1202_v33 }
 0x420   :  { %1149 = vmax.xlane.f32.xlu1 %v1148_v37 }
 0x431   :  { %258 = vrot.lane.b32.xlu1 %v3417_v27, %s3154_s17 }
 0x440   :  { %v1111_v10 = vpop.xlane.xlu0 %1110 }
 0x441   :  { %v1153_v38 = vsub.f32 %v3543_v19, %v1111_v10 }
 0x443   :  { %v1171_v39 = vmul.f32 1.442695, %v1153_v38 }
 0x444   :  { %v1114_v44 = vpop.xlane.xlu0 %1113 }
 0x445   :  { %3066 = vpow2.f32 %v1171_v39  ;;  %v1154_v45 = vsub.f32 %v3548_v28, %v1114_v44 }
 0x447   :  { %v1173_v49 = vmul.f32 1.442695, %v1154_v45 }
 0x448   :  { %v1117_v50 = vpop.xlane.xlu0 %1116 }
 0x449   :  { %3068 = vpow2.f32 %v1173_v49  ;;  %v1155_v0 = vsub.f32 %v3553_v35, %v1117_v50 }
 0x44b   :  { %v1175_v51 = vmul.f32 1.442695, %v1155_v0 }
 0x44c   :  { %v1120_v52 = vpop.xlane.xlu1 %1119 }
 0x44d   :  { %3070 = vpow2.f32 %v1175_v51  ;;  %v1156_v54 = vsub.f32 %v3558_v46, %v1120_v52 }
 0x44f   :  { %v1177_v55 = vmul.f32 1.442695, %v1156_v54  ;;  %v1392_v54 = vsel %vm1298_vm3, %v3577_v13, 0 }
 0x450   :  { %v1123_v56 = vpop.xlane.xlu0 %1122 }
 0x451   :  { %3072 = vpow2.f32 %v1177_v55  ;;  %v1157_v19 = vsub.f32 %v3563_v53, %v1123_v56 }
 0x452   :  { %v3647_v58 = vpop.eup %3066 }
 0x453   :  { %v1179_v59 = vmul.f32 1.442695, %v1157_v19  ;;  %v1205_v28 = vsel %vm276_vm2, %v3647_v58, 0.0 }
 0x454   :  { %v1126_v61 = vpop.xlane.xlu1 %1125  ;;  %1206 = vadd.xlane.f32.xlu0 %v1205_v28 }
 0x455   :  { %3074 = vpow2.f32 %v1179_v59  ;;  %v1158_v35 = vsub.f32 %v3568_v60, %v1126_v61 }
 0x456   :  { %v3652_v62 = vpop.eup %3068 }
 0x457   :  { %v1181_v63 = vmul.f32 1.442695, %v1158_v35  ;;  %v1208_v46 = vsel %vm276_vm2, %v3652_v62, 0.0 }
 0x458   :  { %1209 = vadd.xlane.f32.xlu1 %v1208_v46  ;;  %v1129_v1 = vpop.xlane.xlu0 %1128 }
 0x459   :  { %3076 = vpow2.f32 %v1181_v63  ;;  %v1159_v53 = vsub.f32 %v3573_v5, %v1129_v1 }
 0x45a   :  { %v3657_v2 = vpop.eup %3070 }
 0x45b   :  { %v1183_v3 = vmul.f32 1.442695, %v1159_v53  ;;  %v1211_v6 = vsel %vm276_vm2, %v3657_v2, 0.0 }
 0x45c   :  { %v1132_v7 = vpop.xlane.xlu1 %1131  ;;  %1212 = vadd.xlane.f32.xlu0 %v1211_v6 }
 0x45d   :  { %3078 = vpow2.f32 %v1183_v3  ;;  %v1160_v60 = vsub.f32 %v3580_v14, %v1132_v7 }
 0x45e   :  { %v3662_v8 = vpop.eup %3072 }
 0x45f   :  { %v1185_v9 = vmul.f32 1.442695, %v1160_v60  ;;  %v1214_v41 = vsel %vm276_vm2, %v3662_v8, 0.0 }
 0x460   :  { %1215 = vadd.xlane.f32.xlu1 %v1214_v41  ;;  %v1135_v12 = vpop.xlane.xlu0 %1134 }
 0x461   :  { %3080 = vpow2.f32 %v1185_v9  ;;  %v1161_v5 = vsub.f32 %v3585_v23, %v1135_v12 }
 0x462   :  { %v3667_v17 = vpop.eup %3074 }
 0x463   :  { %v1187_v21 = vmul.f32 1.442695, %v1161_v5  ;;  %v1217_v24 = vsel %vm276_vm2, %v3667_v17, 0.0  ;;  %v1438_v5 = vsel %vm1298_vm3, %v3609_v16, 0 }
 0x464   :  { %v1138_v25 = vpop.xlane.xlu1 %1137  ;;  %1218 = vadd.xlane.f32.xlu0 %v1217_v24 }
 0x465   :  { %3082 = vpow2.f32 %v1187_v21  ;;  %v1162_v14 = vsub.f32 %v3592_v34, %v1138_v25 }
 0x466   :  { %v3672_v30 = vpop.eup %3076 }
 0x467   :  { %v1189_v31 = vmul.f32 1.442695, %v1162_v14  ;;  %v1220_v33 = vsel %vm276_vm2, %v3672_v30, 0.0 }
 0x468   :  { %1221 = vadd.xlane.f32.xlu1 %v1220_v33  ;;  %v1141_v49 = vpop.xlane.xlu0 %1140 }
 0x469   :  { %3084 = vpow2.f32 %v1189_v31  ;;  %v1163_v55 = vsub.f32 %v3599_v48, %v1141_v49 }
 0x46a   :  { %v3676_v23 = vpop.eup %3078 }
 0x46b   :  { %v1223_v37 = vsel %vm276_vm2, %v3676_v23, 0.0  ;;  %v1191_v59 = vmul.f32 1.442695, %v1163_v55 }
 0x46c   :  { %1224 = vadd.xlane.f32.xlu0 %v1223_v37  ;;  %v1144_v56 = vpop.xlane.xlu1 %1143 }
 0x46e   :  { %v3680_v10 = vpop.eup %3080 }
 0x46f   :  { %v1226_v38 = vsel %vm276_vm2, %v3680_v10, 0.0 }
 0x470   :  { %1227 = vadd.xlane.f32.xlu1 %v1226_v38  ;;  %v3706_v48 = vpop.permute.xlu1 %254 }
 0x472   :  { %v3684_v34 = vpop.eup %3082 }
 0x473   :  { %v1229_v39 = vsel %vm276_vm2, %v3684_v34, 0.0 }
 0x474   :  { %1230 = vadd.xlane.f32.xlu1 %v1229_v39  ;;  %v3708_v35 = vpop.permute.xlu1 %256 }
 0x476   :  { %v3688_v44 = vpop.eup %3084 }
 0x477   :  { %v1232_v45 = vsel %vm276_vm2, %v3688_v44, 0.0 }
 0x478   :  { %1233 = vadd.xlane.f32.xlu0 %v1232_v45 }
 0x47d   :  { %v1201_v50 = vpop.xlane.xlu0 %1200 }
 0x47e   :  { %3086 = vrcp.f32 %v1201_v50 }
 0x47f   :  { %3088 = vpow2.f32 %v1191_v59 }
 0x481   :  { %v1147_v19 = vpop.xlane.xlu0 %1146 }
 0x482   :  { %v1165_v28 = vsub.f32 %v3616_v18, %v1147_v19  ;;  %v1622_v19 = vsel %vm1298_vm3, %v3626_v22, 0 }
 0x484   :  { %v1195_v13 = vmul.f32 1.442695, %v1165_v28 }
 0x485   :  { %262 = vrot.lane.b32.xlu1 %v3417_v27, %s3156_s18  ;;  %v253_v16 = vpop.permute.xlu0 %252 }
 0x486   :  { %v1668_v28 = vsel %vm1298_vm3, %v253_v16, 0 }
 0x48b   :  { %v3087_v0 = vpop.eup %3086 }
 0x48c   :  { %v1263_v51 = vmul.f32 %v3087_v0, %v3611_v4  ;;  %v1164_v4 = vsub.f32 %v3604_v57, %v1144_v56  ;;  %v3710_v63 = vpop.eup %3088  ;;  %v1530_v0 = vsel %vm1298_vm3, %v3620_v20, 0 }
 0x48d   :  { %v1235_v57 = vsel %vm276_vm2, %v3710_v63, 0.0 }
 0x48e   :  { %260 = vrot.lane.b32.xlu0 %v3415_v26, %s3156_s18  ;;  %v1279_v52 = vpack.c.bf16 %v1263_v51, %v1263_v51  ;;  %v1193_v61 = vmul.f32 1.442695, %v1164_v4 }
 0x490   :  { %2856 = vmatmul.mubr.msk.bf16.vlgmr.msra.gmra.mxu0 %vm276_vm2, %v1279_v52  ;;  %3090 = vpow2.f32 %v1193_v61 }
 0x491   :  { %2866 = vmatpush3.bf16.msra.mxu0 %v1392_v54  ;;  %2867 = vmatprep.mubr.msk.bf16.mxu0 %vm3155_vm1, %v3149_v40  ;;  %3092 = vpow2.f32 %v1195_v13  ;;  %v1576_v54 = vsel %vm1298_vm3, %v3596_v47, 0 }
 0x492   :  { %2877 = vmatprep.subr.bf16.mxu0 %v3149_v40 }
 0x49d   :  { %v3712_v1 = vpop.eup %3090 }
 0x49e   :  { %v3716_v53 = vpop.eup %3092  ;;  %v1238_v7 = vsel %vm276_vm2, %v3712_v1, 0.0 }
 0x49f   :  { %v1241_v60 = vsel %vm276_vm2, %v3716_v53, 0.0 }
 0x4a5   :  { %v1204_v46 = vpop.xlane.xlu1 %1203 }
 0x4a6   :  { %3094 = vrcp.f32 %v1204_v46  ;;  %v1714_v46 = vsel %vm1298_vm3, %v3706_v48, 0 }
 0x4a9   :  { %v1150_v18 = vpop.xlane.xlu1 %1149  ;;  %1236 = vadd.xlane.f32.xlu1 %v1235_v57 }
 0x4aa   :  { %v1166_v3 = vsub.f32 %v3636_v36, %v1150_v18 }
 0x4ac   :  { %v1197_v6 = vmul.f32 1.442695, %v1166_v3  ;;  %v1760_v3 = vsel %vm1298_vm3, %v3708_v35, 0 }
 0x4ad   :  { %1239 = vadd.xlane.f32.xlu0 %v1238_v7  ;;  %1242 = vadd.xlane.f32.xlu1 %v1241_v60 }
 0x4ae   :  { %3096 = vpow2.f32 %v1197_v6 }
 0x4b3   :  { %v3095_v9 = vpop.eup %3094 }
 0x4b4   :  { %v1264_v41 = vmul.f32 %v3095_v9, %v3631_v32  ;;  %v3738_v32 = vpop.permute.xlu1 %258 }
 0x4b5   :  { %v1806_v7 = vsel %vm1298_vm3, %v3738_v32, 0 }
 0x4b6   :  { %v1280_v12 = vpack.c.bf16 %v1264_v41, %v1264_v41 }
 0x4b8   :  { %2862 = vmatmul.mubr.msk.bf16.vlgmr.msra.gmra.mxu1 %vm276_vm2, %v1280_v12 }
 0x4b9   :  { %2872 = vmatpush3.bf16.msra.mxu1 %v1438_v5  ;;  %2873 = vmatprep.mubr.msk.bf16.mxu1 %vm3155_vm1, %v3149_v40 }
 0x4ba   :  { %2883 = vmatprep.subr.bf16.mxu1 %v3149_v40 }
 0x4bb   :  { %v3730_v36 = vpop.eup %3096 }
 0x4bc   :  { %v1244_v21 = vsel %vm276_vm2, %v3730_v36, 0.0 }
 0x4bd   :  { %1245 = vadd.xlane.f32.xlu0 %v1244_v21 }
 0x4be   :  { %266 = vrot.lane.b32.xlu1 %v3417_v27, %s3158_s20 }
 0x4d3   :  { %264 = vrot.lane.b32.xlu0 %v3415_v26, %s3158_s20  ;;  %v1484_v26 = vsel %vm1298_vm3, %v3587_v29, 0 }
 0x4dd   :  { %v1207_v24 = vpop.xlane.xlu0 %1206 }
 0x4de   :  { %3098 = vrcp.f32 %v1207_v24 }
 0x4e1   :  { %v1210_v25 = vpop.xlane.xlu1 %1209 }
 0x4e2   :  { %3100 = vrcp.f32 %v1210_v25 }
 0x4e5   :  { %v1213_v14 = vpop.xlane.xlu0 %1212 }
 0x4e6   :  { %3102 = vrcp.f32 %v1213_v14 }
 0x4e9   :  { %v1216_v31 = vpop.xlane.xlu1 %1215 }
 0x4ea   :  { %3104 = vrcp.f32 %v1216_v31 }
 0x4eb   :  { %v3099_v33 = vpop.eup %3098 }
 0x4ec   :  { %v1265_v37 = vmul.f32 %v3099_v33, %v3647_v58 }
 0x4ed   :  { %v1219_v38 = vpop.xlane.xlu0 %1218 }
 0x4ee   :  { %3106 = vrcp.f32 %v1219_v38  ;;  %v1281_v27 = vpack.c.bf16 %v1265_v37, %v1265_v37 }
 0x4ef   :  { %v3101_v39 = vpop.eup %3100 }
 0x4f0   :  { %2868 = vmatmul.mubr.msk.bf16.vlgmr.msra.gmra.mxu0 %vm276_vm2, %v1281_v27  ;;  %v1266_v45 = vmul.f32 %v3101_v39, %v3652_v62 }
 0x4f1   :  { %2878 = vmatpush3.bf16.msra.mxu0 %v1484_v26  ;;  %v1222_v49 = vpop.xlane.xlu1 %1221  ;;  %2879 = vmatprep.mubr.msk.bf16.mxu0 %vm3155_vm1, %v3149_v40 }
 0x4f2   :  { %3108 = vrcp.f32 %v1222_v49  ;;  %v1282_v50 = vpack.c.bf16 %v1266_v45, %v1266_v45  ;;  %2889 = vmatprep.subr.bf16.mxu0 %v3149_v40 }
 0x4f3   :  { %v3103_v58 = vpop.eup %3102 }
 0x4f4   :  { %2874 = vmatmul.mubr.msk.bf16.vlgmr.msra.gmra.mxu1 %vm276_vm2, %v1282_v50  ;;  %v1267_v29 = vmul.f32 %v3103_v58, %v3657_v2 }
 0x4f5   :  { %2884 = vmatpush3.bf16.msra.mxu1 %v1530_v0  ;;  %v1225_v51 = vpop.xlane.xlu0 %1224  ;;  %2885 = vmatprep.mubr.msk.bf16.mxu1 %vm3155_vm1, %v3149_v40 }
 0x4f6   :  { %3110 = vrcp.f32 %v1225_v51  ;;  %v1283_v62 = vpack.c.bf16 %v1267_v29, %v1267_v29  ;;  %2895 = vmatprep.subr.bf16.mxu1 %v3149_v40 }
 0x4f7   :  { %v3105_v52 = vpop.eup %3104 }
 0x4f8   :  { %2880 = vmatmul.mubr.msk.bf16.vlgmr.msra.gmra.mxu0 %vm276_vm2, %v1283_v62  ;;  %v1268_v20 = vmul.f32 %v3105_v52, %v3662_v8 }
 0x4f9   :  { %2890 = vmatpush3.bf16.msra.mxu0 %v1576_v54  ;;  %v1228_v55 = vpop.xlane.xlu1 %1227  ;;  %2891 = vmatprep.mubr.msk.bf16.mxu0 %vm3155_vm1, %v3149_v40 }
 0x4fa   :  { %3112 = vrcp.f32 %v1228_v55  ;;  %v1284_v2 = vpack.c.bf16 %v1268_v20, %v1268_v20  ;;  %2901 = vmatprep.subr.bf16.mxu0 %v3149_v40 }
 0x4fb   :  { %v3107_v56 = vpop.eup %3106 }
 0x4fc   :  { %2886 = vmatmul.mubr.msk.bf16.vlgmr.msra.gmra.mxu1 %vm276_vm2, %v1284_v2  ;;  %v1269_v47 = vmul.f32 %v3107_v56, %v3667_v17 }
 0x4fd   :  { %2896 = vmatpush3.bf16.msra.mxu1 %v1622_v19  ;;  %v1231_v4 = vpop.xlane.xlu1 %1230  ;;  %2897 = vmatprep.mubr.msk.bf16.mxu1 %vm3155_vm1, %v3149_v40 }
 0x4fe   :  { %3114 = vrcp.f32 %v1231_v4  ;;  %v1285_v8 = vpack.c.bf16 %v1269_v47, %v1269_v47  ;;  %2907 = vmatprep.subr.bf16.mxu1 %v3149_v40 }
 0x4ff   :  { %v3109_v59 = vpop.eup %3108 }
 0x500   :  { %2892 = vmatmul.mubr.msk.bf16.vlgmr.msra.gmra.mxu0 %vm276_vm2, %v1285_v8  ;;  %v1270_v22 = vmul.f32 %v3109_v59, %v3672_v30 }
 0x501   :  { %2902 = vmatpush3.bf16.msra.mxu0 %v1668_v28  ;;  %v1234_v61 = vpop.xlane.xlu0 %1233  ;;  %2903 = vmatprep.mubr.msk.bf16.mxu0 %vm3155_vm1, %v3149_v40  ;;  %v263_v5 = vpop.permute.xlu1 %262 }
 0x502   :  { %3116 = vrcp.f32 %v1234_v61  ;;  %v1286_v17 = vpack.c.bf16 %v1270_v22, %v1270_v22  ;;  %2913 = vmatprep.subr.bf16.mxu0 %v3149_v40  ;;  %v1898_v21 = vsel %vm1298_vm3, %v263_v5, 0 }
 0x503   :  { %v3111_v13 = vpop.eup %3110 }
 0x504   :  { %2898 = vmatmul.mubr.msk.bf16.vlgmr.msra.gmra.mxu1 %vm276_vm2, %v1286_v17  ;;  %v1271_v57 = vmul.f32 %v3111_v13, %v3676_v23 }
 0x505   :  { %2908 = vmatpush3.bf16.msra.mxu1 %v1714_v46  ;;  %2909 = vmatprep.mubr.msk.bf16.mxu1 %vm3155_vm1, %v3149_v40  ;;  %v261_v35 = vpop.permute.xlu0 %260 }
 0x506   :  { %v1287_v30 = vpack.c.bf16 %v1271_v57, %v1271_v57  ;;  %2919 = vmatprep.subr.bf16.mxu1 %v3149_v40  ;;  %v1852_v41 = vsel %vm1298_vm3, %v261_v35, 0 }
 0x507   :  { %v3113_v18 = vpop.eup %3112 }
 0x508   :  { %2904 = vmatmul.mubr.msk.bf16.vlgmr.msra.gmra.mxu0 %vm276_vm2, %v1287_v30  ;;  %v1272_v6 = vmul.f32 %v3113_v18, %v3680_v10 }
 0x509   :  { %2914 = vmatpush3.bf16.msra.mxu0 %v1760_v3  ;;  %2915 = vmatprep.mubr.msk.bf16.mxu0 %vm3155_vm1, %v3149_v40 }
 0x50a   :  { %v1288_v23 = vpack.c.bf16 %v1272_v6, %v1272_v6  ;;  %2925 = vmatprep.subr.bf16.mxu0 %v3149_v40 }
 0x50b   :  { %v3115_v48 = vpop.eup %3114 }
 0x50c   :  { %2910 = vmatmul.mubr.msk.bf16.vlgmr.msra.gmra.mxu1 %vm276_vm2, %v1288_v23  ;;  %v1273_v60 = vmul.f32 %v3115_v48, %v3684_v34 }
 0x50d   :  { %2920 = vmatpush3.bf16.msra.mxu1 %v1806_v7  ;;  %2921 = vmatprep.mubr.msk.bf16.mxu1 %vm3155_vm1, %v3149_v40 }
 0x50e   :  { %v1289_v10 = vpack.c.bf16 %v1273_v60, %v1273_v60  ;;  %2931 = vmatprep.subr.bf16.mxu1 %v3149_v40 }
 0x50f   :  { %v3117_v9 = vpop.eup %3116 }
 0x510   :  { %2916 = vmatmul.mubr.msk.bf16.vlgmr.msra.gmra.mxu0 %vm276_vm2, %v1289_v10  ;;  %v1274_v12 = vmul.f32 %v3117_v9, %v3688_v44 }
 0x511   :  { %2926 = vmatpush3.bf16.msra.mxu0 %v1852_v41  ;;  %2927 = vmatprep.mubr.msk.bf16.mxu0 %vm3155_vm1, %v3149_v40 }
 0x512   :  { %v1290_v34 = vpack.c.bf16 %v1274_v12, %v1274_v12  ;;  %2937 = vmatprep.subr.bf16.mxu0 %v3149_v40 }
 0x514   :  { %2922 = vmatmul.mubr.msk.bf16.vlgmr.msra.gmra.mxu1 %vm276_vm2, %v1290_v34 }
 0x515   :  { %2932 = vmatpush3.bf16.msra.mxu1 %v1898_v21  ;;  %2933 = vmatprep.mubr.msk.bf16.mxu1 %vm3155_vm1, %v3149_v40 }
 0x516   :  { %2943 = vmatprep.subr.bf16.mxu1 %v3149_v40 }
 0x532   :  { %v1237_v16 = vpop.xlane.xlu1 %1236 }
 0x533   :  { %3118 = vrcp.f32 %v1237_v16 }
 0x536   :  { %v1243_v44 = vpop.xlane.xlu1 %1242  ;;  %v1240_v32 = vpop.xlane.xlu0 %1239 }
 0x537   :  { %3120 = vrcp.f32 %v1240_v32 }
 0x538   :  { %3122 = vrcp.f32 %v1243_v44 }
 0x53a   :  { %v267_v27 = vpop.permute.xlu1 %266 }
 0x53b   :  { %v1990_v45 = vsel %vm1298_vm3, %v267_v27, 0 }
 0x540   :  { %v3119_v24 = vpop.eup %3118 }
 0x541   :  { %v1275_v25 = vmul.f32 %v3119_v24, %v3710_v63 }
 0x543   :  { %v1291_v14 = vpack.c.bf16 %v1275_v25, %v1275_v25 }
 0x544   :  { %v3121_v31 = vpop.eup %3120 }
 0x545   :  { %2928 = vmatmul.mubr.msk.bf16.vlgmr.msra.gmra.mxu0 %vm276_vm2, %v1291_v14  ;;  %v3123_v33 = vpop.eup %3122  ;;  %v1276_v38 = vmul.f32 %v3121_v31, %v3712_v1 }
 0x546   :  { %v1246_v37 = vpop.xlane.xlu0 %1245  ;;  %2939 = vmatprep.mubr.msk.bf16.mxu0 %vm3155_vm1, %v3149_v40  ;;  %v1277_v26 = vmul.f32 %v3123_v33, %v3716_v53 }
 0x547   :  { %3124 = vrcp.f32 %v1246_v37  ;;  %v1292_v39 = vpack.c.bf16 %v1276_v38, %v1276_v38 }
 0x548   :  { %v1293_v1 = vpack.c.bf16 %v1277_v26, %v1277_v26 }
 0x549   :  { %2934 = vmatmul.mubr.msk.bf16.vlgmr.msra.gmra.mxu1 %vm276_vm2, %v1292_v39 }
 0x54a   :  { %v265_v63 = vpop.permute.xlu0 %264  ;;  %2944 = vmatpush3.bf16.msra.mxu1 %v1990_v45  ;;  %2945 = vmatprep.mubr.msk.bf16.mxu1 %vm3155_vm1, %v3149_v40  ;;  %v3026_v45 = vld [vmem:[%s3980_s5 + $0x18] sm:$0xff]  }
 0x54b   :  { %v1944_v49 = vsel %vm1298_vm3, %v265_v63, 0 }
 0x54c   :  { %2938 = vmatpush3.bf16.msra.mxu0 %v1944_v49  ;;  %v3027_v49 = vld [vmem:[%s3980_s5 + $0x10] sm:$0xff]  }
 0x54d   :  { %2949 = vmatprep.subr.bf16.mxu0 %v3149_v40 }
 0x54f   :  { %2940 = vmatmul.mubr.msk.bf16.vlgmr.msra.gmra.mxu0 %vm276_vm2, %v1293_v1 }
 0x550   :  { %v3820_v50 = vpop.f32.mrf.mxu0  ;;  %2957 = vmatprep.mubr.msk.bf16.mxu0 %vm3155_vm1, %v3149_v40  ;;  %2950 = vmatpush3.bf16.msra.mxu0 %v3026_v45 }
 0x551   :  { %2951 = vmatprep.subr.bf16.mxu0 %v3149_v40 }
 0x552   :  { %v2857_v53 = vpop.f32.mrf.mxu0 }
 0x554   :  { %v3125_v58 = vpop.eup %3124  ;;  %v1339_v0 = vpop.f32.mrf.mxu0  ;;  %2952 = vmatpush3.bf16.msra.mxu0 %v3027_v49 }
 0x555   :  { %v1278_v29 = vmul.f32 %v3125_v58, %v3730_v36  ;;  %v3028_v58 = vld [vmem:[%s3980_s5 + $0x8] sm:$0xff]   ;;  %2953 = vmatprep.subr.bf16.mxu0 %v3149_v40 }
 0x556   :  { %v2858_v51 = vpop.f32.mrf.mxu0 }
 0x557   :  { %v1294_v62 = vpack.c.bf16 %v1278_v29, %v1278_v29 }
 0x558   :  { %2954 = vmatpush3.bf16.msra.mxu0 %v3028_v58 }
 0x559   :  { %2946 = vmatmul.mubr.msk.bf16.vlgmr.msra.gmra.mxu1 %vm276_vm2, %v1294_v62  ;;  %2955 = vmatprep.subr.bf16.mxu0 %v3149_v40 }
 0x55a   :  { %2334 = vmatprep.mubr.bf16.mxu1 %v3148_v15 }
 0x578   :  { %v3827_v52 = vpop.f32.mrf.mxu1 }
 0x57a   :  { %v2863_v54 = vpop.f32.mrf.mxu1 }
 0x57c   :  { %v1385_v20 = vpop.f32.mrf.mxu1 }
 0x57e   :  { %v2864_v55 = vpop.f32.mrf.mxu1 }
 0x5b0   :  { %v1428_v2 = vpop.f32.mrf.mxu0 }
 0x5b2   :  { %v2869_v56 = vpop.f32.mrf.mxu0 }
 0x5b3   :  { %v3029_v56 = vld [vmem:[%s3980_s5] sm:$0xff]  }
 0x5b4   :  { %v1431_v19 = vpop.f32.mrf.mxu0  ;;  %v1474_v47 = vpop.f32.mrf.mxu1  ;;  %2956 = vmatpush3.bf16.msra.mxu0 %v3029_v56 }
 0x5b5   :  { %v2979_v4 = vpack.i.bf16 %v1474_v47, %v1428_v2 }
 0x5b6   :  { %v2870_v8 = vpop.f32.mrf.mxu0  ;;  %v2875_v59 = vpop.f32.mrf.mxu1 }
 0x5b7   :  { %2980 = vrot.lane.b32.xlu0 %v2979_v4, %s3159_s21 }
 0x5b8   :  { %v1477_v36 = vpop.f32.mrf.mxu1  ;;  %v1520_v28 = vpop.f32.mrf.mxu0 }
 0x5ba   :  { %v2876_v22 = vpop.f32.mrf.mxu1  ;;  %v2881_v61 = vpop.f32.mrf.mxu0 }
 0x5bc   :  { %v1523_v17 = vpop.f32.mrf.mxu0  ;;  %v1566_v15 = vpop.f32.mrf.mxu1 }
 0x5bd   :  { %v2984_v13 = vpack.i.bf16 %v1566_v15, %v1520_v28 }
 0x5be   :  { %v2882_v46 = vpop.f32.mrf.mxu0  ;;  %v2887_v57 = vpop.f32.mrf.mxu1 }
 0x5bf   :  { %2985 = vrot.lane.b32.xlu1 %v2984_v13, %s3160_s22 }
 0x5c0   :  { %v1569_v30 = vpop.f32.mrf.mxu1  ;;  %v1612_v18 = vpop.f32.mrf.mxu0 }
 0x5c2   :  { %v2888_v3 = vpop.f32.mrf.mxu1  ;;  %v2893_v6 = vpop.f32.mrf.mxu0 }
 0x5c4   :  { %v1615_v23 = vpop.f32.mrf.mxu0  ;;  %v1658_v48 = vpop.f32.mrf.mxu1 }
 0x5c5   :  { %v2989_v7 = vpack.i.bf16 %v1658_v48, %v1612_v18 }
 0x5c6   :  { %v2894_v60 = vpop.f32.mrf.mxu0  ;;  %v2899_v35 = vpop.f32.mrf.mxu1 }
 0x5c7   :  { %2990 = vrot.lane.b32.xlu0 %v2989_v7, %s3161_s23 }
 0x5c8   :  { %v1661_v10 = vpop.f32.mrf.mxu1  ;;  %v1704_v9 = vpop.f32.mrf.mxu0 }
 0x5ca   :  { %v2900_v41 = vpop.f32.mrf.mxu1  ;;  %v2905_v12 = vpop.f32.mrf.mxu0 }
 0x5cc   :  { %v1707_v5 = vpop.f32.mrf.mxu0  ;;  %v1750_v34 = vpop.f32.mrf.mxu1 }
 0x5cd   :  { %v2994_v21 = vpack.i.bf16 %v1750_v34, %v1704_v9 }
 0x5ce   :  { %v2906_v16 = vpop.f32.mrf.mxu0  ;;  %v2911_v44 = vpop.f32.mrf.mxu1 }
 0x5cf   :  { %2995 = vrot.lane.b32.xlu1 %v2994_v21, %s3162_s24 }
 0x5d0   :  { %v1753_v32 = vpop.f32.mrf.mxu1  ;;  %v1796_v24 = vpop.f32.mrf.mxu0 }
 0x5d2   :  { %v2912_v25 = vpop.f32.mrf.mxu1  ;;  %v2917_v14 = vpop.f32.mrf.mxu0 }
 0x5d4   :  { %v1799_v31 = vpop.f32.mrf.mxu0  ;;  %v1842_v33 = vpop.f32.mrf.mxu1 }
 0x5d5   :  { %v2999_v37 = vpack.i.bf16 %v1842_v33, %v1796_v24 }
 0x5d6   :  { %v2918_v38 = vpop.f32.mrf.mxu0  ;;  %v2923_v27 = vpop.f32.mrf.mxu1 }
 0x5d7   :  { %3000 = vrot.lane.b32.xlu0 %v2999_v37, %s3163_s25  ;;  %v2624_v27 = vld [vmem:[%s3981_s6] ss:$0 sm:$0xff] }
 0x5d8   :  { %v1845_v39 = vpop.f32.mrf.mxu1 }
 0x5da   :  { %v2924_v26 = vpop.f32.mrf.mxu1 }
 0x605   :  { %v1888_v63 = vpop.f32.mrf.mxu0 }
 0x607   :  { %v2929_v1 = vpop.f32.mrf.mxu0 }
 0x609   :  { %v1891_v53 = vpop.f32.mrf.mxu0  ;;  %v1934_v0 = vpop.f32.mrf.mxu1 }
 0x60a   :  { %v3004_v29 = vpack.i.bf16 %v1934_v0, %v1888_v63  ;;  %v3146_v63 = vld [vmem:[%s3975_s0] sm:$0xff] }
 0x60b   :  { %v2930_v51 = vpop.f32.mrf.mxu0  ;;  %v2935_v62 = vpop.f32.mrf.mxu1 }
 0x60c   :  { %3005 = vrot.lane.b32.xlu1 %v3004_v29, %s3164_s1  ;;  %v3147_v29 = vld [vmem:[%s3975_s0 + $0x8] sm:$0xff] }
 0x60d   :  { %v1937_v54 = vpop.f32.mrf.mxu1 }
 0x60f   :  { %v1980_v20 = vpop.f32.mrf.mxu0  ;;  %v2936_v55 = vpop.f32.mrf.mxu1 }
 0x611   :  { %v2941_v2 = vpop.f32.mrf.mxu0 }
 0x613   :  { %v1983_v19 = vpop.f32.mrf.mxu0 }
 0x615   :  { %v2942_v47 = vpop.f32.mrf.mxu0 }
 0x619   :  { %v2026_v4 = vpop.f32.mrf.mxu1 }
 0x61a   :  { %v3009_v8 = vpack.i.bf16 %v2026_v4, %v1980_v20 }
 0x61b   :  { %v2947_v59 = vpop.f32.mrf.mxu1 }
 0x61c   :  { %3010 = vrot.lane.b32.xlu0 %v3009_v8, %s3165_s4 }
 0x61d   :  { %v2029_v36 = vpop.f32.mrf.mxu1 }
 0x61e   :  { %v3032_v36 = vld [vmem:[%s3982_s9 + $0x34] ss:$8 sps:$4 sm:$0xff]  }
 0x61f   :  { %v2948_v28 = vpop.f32.mrf.mxu1  ;;  %2310 = vmatprep.subr.bf16.mxu1 %v3032_v36 }
 0x620   :  { %v3030_v28 = vld [vmem:[%s3982_s9 + $0x30] ss:$8 sps:$4 sm:$0xff]  }
 0x621   :  { %2311 = vmatpush1.bf16.msra.mxu1 %v3030_v28 }
 0x629   :  { %v2981_v22 = vpop.permute.xlu0 %2980 }
 0x62a   :  { %v2983_v15 = vunpack.i.h.bf16 %v2981_v22  ;;  %v2982_v13 = vunpack.i.l.bf16 %v2981_v22  ;;  %v3035_v22 = vld [vmem:[%s3982_s9 + $0x24] ss:$8 sps:$4 sm:$0xff]  }
 0x62b   :  { %2312 = vmatprep.subr.bf16.mxu1 %v3035_v22 }
 0x62c   :  { %v2089_v7 = vsel %vm276_vm2, %v3827_v52, %v2983_v15  ;;  %v2088_v60 = vsel %vm276_vm2, %v3820_v50, %v2982_v13  ;;  %v3041_v15 = vld [vmem:[%s3982_s9 + $0x4] ss:$8 sps:$4 sm:$0xff]   ;;  %v3039_v13 = vld [vmem:[%s3982_s9] ss:$8 sps:$4 sm:$0xff]  }
 0x631   :  { %v2986_v61 = vpop.permute.xlu1 %2985 }
 0x632   :  { %v2988_v46 = vunpack.i.h.bf16 %v2986_v61  ;;  %v2987_v57 = vunpack.i.l.bf16 %v2986_v61  ;;  %v3033_v61 = vld [vmem:[%s3982_s9 + $0x20] ss:$8 sps:$4 sm:$0xff]  }
 0x633   :  { %2313 = vmatpush1.bf16.msra.mxu1 %v3033_v61 }
 0x634   :  { %v2091_v9 = vsel %vm2090_vm5, %v2088_v60, %v2987_v57  ;;  %v2092_v41 = vsel %vm2090_vm5, %v2089_v7, %v2988_v46  ;;  %v2630_v7 = vld [vmem:[%s3983_s7] ss:$0 sm:$0xff] }
 0x639   :  { %v2991_v40 = vpop.permute.xlu0 %2990 }
 0x63a   :  { %v2993_v18 = vunpack.i.h.bf16 %v2991_v40  ;;  %v2992_v3 = vunpack.i.l.bf16 %v2991_v40  ;;  %v3036_v40 = vld [vmem:[%s3982_s9 + $0x10] ss:$8 sps:$4 sm:$0xff]  }
 0x63c   :  { %v2094_v34 = vsel %vm2093_vm6, %v2091_v9, %v2992_v3  ;;  %v2095_v21 = vsel %vm2093_vm6, %v2092_v41, %v2993_v18  ;;  %v2631_v9 = vld [vmem:[%s3984_s8] ss:$0 sm:$0xff] }
 0x641   :  { %v2996_v17 = vpop.permute.xlu1 %2995 }
 0x642   :  { %v2998_v23 = vunpack.i.h.bf16 %v2996_v17  ;;  %v2997_v48 = vunpack.i.l.bf16 %v2996_v17  ;;  %v3038_v17 = vld [vmem:[%s3982_s9 + $0x14] ss:$8 sps:$4 sm:$0xff]  }
 0x643   :  { %2314 = vmatprep.subr.bf16.mxu1 %v3038_v17 }
 0x644   :  { %v2097_v16 = vsel %vm2096_vm7, %v2094_v34, %v2997_v48  ;;  %v2098_v44 = vsel %vm2096_vm7, %v2095_v21, %v2998_v23  ;;  %2315 = vmatpush1.bf16.msra.mxu1 %v3036_v40  ;;  %v3042_v21 = vld [vmem:[%s3985_s11 + $0x78] sm:$0xff]  }
 0x645   :  { %2316 = vmatprep.subr.bf16.mxu1 %v3041_v15  ;;  %2735 = vmatprep.subr.bf16.mxu0 %v3042_v21 }
 0x648   :  { %2317 = vmatpush1.bf16.msra.mxu1 %v3039_v13 }
 0x649   :  { %v3001_v30 = vpop.permute.xlu0 %3000 }
 0x64a   :  { %v3003_v35 = vunpack.i.h.bf16 %v3001_v30  ;;  %v3002_v10 = vunpack.i.l.bf16 %v3001_v30 }
 0x64c   :  { %v2100_v32 = vsel %vm2099_vm8, %v2097_v16, %v3002_v10  ;;  %v2101_v50 = vsel %vm2099_vm8, %v2098_v44, %v3003_v35  ;;  %v3043_v16 = vld [vmem:[%s3985_s11 + $0x38] sm:$0xff]   ;;  %v3044_v44 = vld [vmem:[%s3985_s11 + $0x70] sm:$0xff]  }
 0x67e   :  { %v3006_v6 = vpop.permute.xlu1 %3005 }
 0x67f   :  { %v3008_v12 = vunpack.i.h.bf16 %v3006_v6  ;;  %v3007_v5 = vunpack.i.l.bf16 %v3006_v6 }
 0x681   :  { %v2103_v14 = vsel %vm2102_vm9, %v2100_v32, %v3007_v5  ;;  %v2104_v31 = vsel %vm2102_vm9, %v2101_v50, %v3008_v12  ;;  %v3046_v32 = vld [vmem:[%s3985_s11 + $0x68] sm:$0xff]  }
 0x682   :  { %v3047_v50 = vld [vmem:[%s3985_s11 + $0x28] sm:$0xff]  }
 0x68e   :  { %v3011_v52 = vpop.permute.xlu0 %3010 }
 0x68f   :  { %v3013_v24 = vunpack.i.h.bf16 %v3011_v52  ;;  %v3012_v25 = vunpack.i.l.bf16 %v3011_v52  ;;  %v3045_v52 = vld [vmem:[%s3985_s11 + $0x30] sm:$0xff]  }
 0x691   :  { %v2106_v33 = vsel %vm2105_vm10, %v2103_v14, %v3012_v25  ;;  %v2107_v37 = vsel %vm2105_vm10, %v2104_v31, %v3013_v24  ;;  %v3048_v24 = vld [vmem:[%s3985_s11 + $0x60] sm:$0xff]   ;;  %v3050_v14 = vld [vmem:[%s3985_s11 + $0x58] sm:$0xff]  }
 0x692   :  { %v2108_v38 = vpack.c.bf16 %v2107_v37, %v2106_v33  ;;  %v3049_v25 = vld [vmem:[%s3985_s11 + $0x20] sm:$0xff]   ;;  %v3051_v31 = vld [vmem:[%s3985_s11 + $0x18] sm:$0xff]   ;;  %v3052_v33 = vld [vmem:[%s3985_s11 + $0x50] sm:$0xff]  }
 0x693   :  { %v3053_v37 = vld [vmem:[%s3985_s11 + $0x10] sm:$0xff]  }
 0x694   :  { %2958 = vmatmul.mubr.msk.bf16.vlgmr.msra.gmra.mxu0 %vm49_vm0, %v2108_v38  ;;  %v3054_v38 = vld [vmem:[%s3985_s11 + $0x48] sm:$0xff]  }
 0x695   :  { %2736 = vmatpush3.bf16.msra.mxu0 %v3043_v16 }
 0x696   :  { %2737 = vmatprep.subr.bf16.mxu0 %v3044_v44 }
 0x699   :  { %2738 = vmatpush3.bf16.msra.mxu0 %v3045_v52 }
 0x69a   :  { %2739 = vmatprep.subr.bf16.mxu0 %v3046_v32 }
 0x69d   :  { %2740 = vmatpush3.bf16.msra.mxu0 %v3047_v50 }
 0x69e   :  { %2741 = vmatprep.subr.bf16.mxu0 %v3048_v24 }
 0x6a1   :  { %2742 = vmatpush3.bf16.msra.mxu0 %v3049_v25 }
 0x6a2   :  { %2743 = vmatprep.subr.bf16.mxu0 %v3050_v14 }
 0x6a5   :  { %2744 = vmatpush3.bf16.msra.mxu0 %v3051_v31 }
 0x6a6   :  { %2745 = vmatprep.subr.bf16.mxu0 %v3052_v33 }
 0x6a9   :  { %2746 = vmatpush3.bf16.msra.mxu0 %v3053_v37 }
 0x6aa   :  { %2747 = vmatprep.subr.bf16.mxu0 %v3054_v38 }
 0x754   :  { %v2185_v39 = vpop.f32.mrf.mxu0 }
 0x755   :  { %v2186_v26 = vadd.f32 %v2624_v27, %v2185_v39  ;;  %v3056_v39 = vld [vmem:[%s3985_s11 + $0x40] sm:$0xff]  }
 0x756   :  { %v2959_v45 = vpop.f32.mrf.mxu0 }
 0x757   :  { %v3861_v49 = vadd.f32 %v3146_v63, %v2186_v26  ;;  %v3057_v26 = vld [vmem:[%s3985_s11] sm:$0xff]  }
 0x758   :  { %v2188_v1 = vpop.f32.mrf.mxu0  ;;  %v2247_v45 = vld [vmem:[%s3986_s10] sm:$0x3] }
 0x759   :  { %v2189_v53 = vadd.f32 %v2624_v27, %v2188_v1  ;;  %v2196_v58 = vsel %vm49_vm0, %v3861_v49, 0.0  ;;  %v3055_v27 = vld [vmem:[%s3985_s11 + $0x8] sm:$0xff]   ;;  %v2252_v63 = vrot.slane %v2247_v45, %v106_v43  ;;  %v2256_v1 = vrot.slane %v2247_v45, %v110_v11 }
 0x75a   :  { %2197 = vadd.xlane.f32.xlu1 %v2196_v58  ;;  %v2960_v0 = vpop.f32.mrf.mxu0  ;;  %2748 = vmatpush3.bf16.msra.mxu0 %v3055_v27 }
 0x75b   :  { %v3868_v51 = vadd.f32 %v3147_v29, %v2189_v53  ;;  %2749 = vmatprep.subr.bf16.mxu0 %v3056_v39 }
 0x75d   :  { %v2199_v62 = vsel %vm49_vm0, %v3868_v51, 0.0 }
 0x75e   :  { %2200 = vadd.xlane.f32.xlu0 %v2199_v62  ;;  %2750 = vmatpush3.bf16.msra.mxu0 %v3057_v26 }
 0x7e3   :  { %v2198_v54 = vpop.xlane.xlu1 %2197 }
 0x7e4   :  { %v2202_v20 = vmul.f32 0.015625, %v2198_v54 }
 0x7e6   :  { %v2204_v55 = vsub.f32 %v3861_v49, %v2202_v20 }
 0x7e7   :  { %v2201_v2 = vpop.xlane.xlu0 %2200 }
 0x7e8   :  { %v2203_v56 = vmul.f32 0.015625, %v2201_v2  ;;  %v2206_v19 = vmul.f32 %v2204_v55, %v2204_v55 }
 0x7ea   :  { %v2205_v47 = vsub.f32 %v3868_v51, %v2203_v56  ;;  %v2208_v4 = vsel %vm49_vm0, %v2206_v19, 0.0 }
 0x7eb   :  { %2209 = vadd.xlane.f32.xlu0 %v2208_v4 }
 0x7ec   :  { %v2207_v8 = vmul.f32 %v2205_v47, %v2205_v47 }
 0x7ee   :  { %v2211_v59 = vsel %vm49_vm0, %v2207_v8, 0.0 }
 0x7ef   :  { %2212 = vadd.xlane.f32.xlu0 %v2211_v59 }
 0x874   :  { %v2210_v46 = vpop.xlane.xlu0 %2209 }
 0x875   :  { %v2214_v57 = vmul.f32 0.015625, %v2210_v46 }
 0x877   :  { %v2216_v30 = vadd.f32 1e-05, %v2214_v57 }
 0x878   :  { %v2213_v18 = vpop.xlane.xlu0 %2212 }
 0x879   :  { %3126 = vrsqrt.f32 %v2216_v30  ;;  %v2215_v3 = vmul.f32 0.015625, %v2213_v18 }
 0x87b   :  { %v2217_v6 = vadd.f32 1e-05, %v2215_v3 }
 0x87d   :  { %3128 = vrsqrt.f32 %v2217_v6 }
 0x886   :  { %v3127_v23 = vpop.eup %3126 }
 0x887   :  { %v2220_v48 = vmul.f32 %v3127_v23, %v2204_v55 }
 0x889   :  { %v2228_v10 = vmul.f32 %v2630_v7, %v2220_v48 }
 0x88a   :  { %v3129_v60 = vpop.eup %3128 }
 0x88b   :  { %v2221_v35 = vmul.f32 %v3129_v60, %v2205_v47  ;;  %v2236_v12 = vadd.f32 %v2631_v9, %v2228_v10  ;;  %v2645_v60 = vld [vmem:[%s3987_s12] ss:$0 sm:$0xff] }
 0x88d   :  { %v2229_v41 = vmul.f32 %v2630_v7, %v2221_v35 }
 0x88f   :  { %v2237_v5 = vadd.f32 %v2631_v9, %v2229_v41 }
 0x891   :  { %v2238_v34 = vpack.c.bf16 %v2237_v5, %v2236_v12 }
 0x893   :  { %2640 = vmatmul.mubr.msk.bf16.vlgmr.msra.gmra.mxu1 %vm49_vm0, %v2238_v34 }
 0x953   :  { %v2336_v53 = vpop.f32.mrf.mxu1 }
 0x954   :  { %v2337_v58 = vadd.f32 %v2336_v53, %v2252_v63 }
 0x955   :  { %v2338_v0 = vpop.f32.mrf.mxu1 }
 0x956   :  { %v2641_v29 = vmul.f32 -1.702, %v2337_v58  ;;  %v2339_v62 = vadd.f32 %v2338_v0, %v2256_v1 }
 0x957   :  { %v2340_v54 = vpop.f32.mrf.mxu1 }
 0x958   :  { %v2353_v20 = vmul.f32 1.442695, %v2641_v29  ;;  %v2642_v55 = vmul.f32 -1.702, %v2339_v62  ;;  %v2341_v2 = vadd.f32 %v2340_v54, %v2252_v63 }
 0x959   :  { %v2342_v56 = vpop.f32.mrf.mxu1 }
 0x95a   :  { %v2355_v19 = vmul.f32 1.442695, %v2642_v55  ;;  %v2643_v47 = vmul.f32 -1.702, %v2341_v2  ;;  %v2343_v4 = vadd.f32 %v2342_v56, %v2256_v1  ;;  %3130 = vpow2.f32 %v2353_v20 }
 0x95c   :  { %3132 = vpow2.f32 %v2355_v19  ;;  %v2357_v8 = vmul.f32 1.442695, %v2643_v47  ;;  %v2644_v43 = vmul.f32 -1.702, %v2343_v4 }
 0x95e   :  { %3134 = vpow2.f32 %v2357_v8  ;;  %v2359_v42 = vmul.f32 1.442695, %v2644_v43 }
 0x960   :  { %3136 = vpow2.f32 %v2359_v42 }
 0x967   :  { %v3131_v11 = vpop.eup %3130 }
 0x968   :  { %v2361_v22 = vadd.f32 1.0, %v3131_v11 }
 0x969   :  { %v3133_v59 = vpop.eup %3132 }
 0x96a   :  { %v2362_v36 = vadd.f32 1.0, %v3133_v59 }
 0x96b   :  { %v3135_v28 = vpop.eup %3134 }
 0x96c   :  { %v2363_v61 = vadd.f32 1.0, %v3135_v28  ;;  %3138 = vrcp.f32 %v2362_v36 }
 0x96d   :  { %v3137_v40 = vpop.eup %3136 }
 0x96e   :  { %3140 = vrcp.f32 %v2363_v61  ;;  %v2364_v17 = vadd.f32 1.0, %v3137_v40 }
 0x96f   :  { %3142 = vrcp.f32 %v2361_v22 }
 0x970   :  { %3144 = vrcp.f32 %v2364_v17 }
 0x979   :  { %v3139_v15 = vpop.eup %3138 }
 0x97a   :  { %v2374_v18 = vmul.f32 %v3139_v15, %v2339_v62 }
 0x97b   :  { %v3141_v13 = vpop.eup %3140 }
 0x97c   :  { %v3143_v46 = vpop.eup %3142  ;;  %v2375_v30 = vmul.f32 %v3141_v13, %v2341_v2 }
 0x97d   :  { %v3145_v57 = vpop.eup %3144  ;;  %v2373_v6 = vmul.f32 %v3143_v46, %v2337_v58 }
 0x97e   :  { %v2376_v3 = vmul.f32 %v3145_v57, %v2343_v4 }
 0x97f   :  { %v2377_v48 = vpack.c.bf16 %v2375_v30, %v2373_v6 }
 0x980   :  { %v2378_v23 = vpack.c.bf16 %v2376_v3, %v2374_v18 }
 0x982   :  { %2546 = vmatprep.mubr.bf16.mxu0 %v2378_v23 }
 0x983   :  { %2547 = vmatmul.mubr.bf16.vlgmr.msra.gmra.mxu0 %v2377_v48 }
 0xa43   :  { %v2751_v7 = vpop.f32.mrf.mxu0 }
 0xa45   :  { %v2752_v35 = vpop.f32.mrf.mxu0 }
 0xa46   :  { %v2753_v10 = vadd.f32 %v2752_v35, %v2751_v7 }
 0xa47   :  { %v2754_v9 = vpop.f32.mrf.mxu0 }
 0xa48   :  { %v2549_v41 = vadd.f32 %v2753_v10, %v2645_v60 }
 0xa49   :  { %v2755_v12 = vpop.f32.mrf.mxu0 }
 0xa4a   :  { %v2555_v5 = vadd.f32 %v2549_v41, %v3861_v49  ;;  %v2756_v34 = vadd.f32 %v2755_v12, %v2754_v9 }
 0xa4c   :  { %2557 = vst.msk [vmem:[%s3988_s13] sm:$0xff] %vm49_vm0, %v2555_v5  ;;  %v2552_v21 = vadd.f32 %v2756_v34, %v2645_v60 }
 0xa4e   :  { %v2556_v16 = vadd.f32 %v2552_v21, %v3868_v51 }
 0xa50   :  { %2558 = vst.msk [vmem:[%s3988_s13 + $0x8] sm:$0xff] %vm49_vm0, %v2556_v16 }

</bundles_post_ra>
